<compile_context>
chip_gen: v7x
topology: tpu7x:2x2x1
jax: 0.10.0
libtpu: 0.0.40
codegen_flags: <defaults>
</compile_context>

<pallas_src>
import functools

import jax
import jax.numpy as jnp
from jax.experimental import pallas as pl
from jax.experimental.pallas import tpu as pltpu

# ------------------------- model hyperparameters -------------------------
SRC_VOCAB_SIZE = 10
SRC_PAD_IDX = 0
EMBED_SIZE = 32
HEADS = 4
HEAD_DIM = EMBED_SIZE // HEADS
FORWARD_EXPANSION = 4
FF_DIM = FORWARD_EXPANSION * EMBED_SIZE
NUM_LAYERS = 2
MAX_LENGTH = 16
LN_EPS = 1e-5


# ----------------------------- helpers -----------------------------------
def _layernorm(x, gamma, beta):
    mu = jnp.mean(x, axis=-1, keepdims=True)
    var = jnp.mean((x - mu) ** 2, axis=-1, keepdims=True)
    return (x - mu) * jax.lax.rsqrt(var + LN_EPS) * gamma + beta


# --------------------------- Pallas kernel --------------------------------
def encoder_kernel(tok_ref, word_ref, posl_ref, mask_ref, wqkv_ref, wfc_ref,
                   w1_ref, w2_ref, vec_ref, out_ref, *,
                   heads, num_layers, batch, seq):
    """Whole Encoder stack (embedding + all layers, all batch) in one launch.

    tok_ref  : (N*L, 1)   int32 token ids
    word_ref : (V, E)     word embedding table
    posl_ref : (L, E)     positional embeddings for the first L positions
    mask_ref : (H*N*L, H*N*L) additive attention bias (0 / -1e20 / -2e20)
    wqkv_ref : (num_layers, D, 3D)  [Wv | Wk | Wq/sqrt(E)]  (shared across heads)
    wfc_ref  : (num_layers, E, E)
    w1_ref   : (num_layers, E, FF)
    w2_ref   : (num_layers, FF, E)
    vec_ref  : (num_layers, 8, FF)  rows: bfc, g1, be1, bf1, bf2, g2, be2, pad
    out_ref  : (N*L, E)
    """
    NL = batch * seq
    vocab, E = word_ref.shape
    D = E // heads

    # ---------------- embedding (fused into the kernel) ----------------
    # word_emb[tok] as one-hot @ table -> a single MXU push; positional
    # embeddings added by statically tiling pos_emb[:L] over the batch.
    tok = tok_ref[...]                                            # (NL, 1) int32
    iota = jax.lax.broadcasted_iota(jnp.int32, (NL, vocab), 1)
    sel = (tok == iota).astype(jnp.float32)                       # (NL, V)
    x = jnp.dot(sel, word_ref[...], preferred_element_type=jnp.float32)
    x = x + jnp.concatenate([posl_ref[...]] * batch, axis=0)      # (NL, E)

    mask = mask_ref[...]                                          # (H*NL, H*NL)

    for layer in range(num_layers):                               # static unroll
        wqkv = wqkv_ref[layer]                                    # (D, 3D)
        wfc = wfc_ref[layer]                                      # (E, E)
        w1 = w1_ref[layer]                                        # (E, FF)
        w2 = w2_ref[layer]                                        # (FF, E)
        vec = vec_ref[layer]                                      # (8, FF)
        bfc = vec[0:1, 0:E]
        g1 = vec[1:2, 0:E]
        be1 = vec[2:3, 0:E]
        bf1 = vec[3:4, :]
        bf2 = vec[4:5, 0:E]
        g2 = vec[5:6, 0:E]
        be2 = vec[6:7, 0:E]

        # ---- fused multi-head attention: 3 MXU pushes, 1 softmax ----
        # Head-major repack of the activation: rows ordered (h, n, l); each
        # piece is a contiguous column slice, so no transposes are needed.
        x_hm = jnp.concatenate(
            [x[:, h * D:(h + 1) * D] for h in range(heads)], axis=0)  # (H*NL, D)
        qkv = jnp.dot(x_hm, wqkv, preferred_element_type=jnp.float32)  # (H*NL, 3D)
        v = qkv[:, 0:D]
        k = qkv[:, D:2 * D]
        q = qkv[:, 2 * D:3 * D]                                   # pre-scaled by 1/sqrt(E)

        # One big masked energy matmul; the additive mask is applied BEFORE the
        # row-max subtraction, so off-(head,batch)-block entries exp() to 0.
        e = jax.lax.dot_general(q, k, (((1,), (1,)), ((), ())),
                                preferred_element_type=jnp.float32)    # (HNL, HNL)
        e = e + mask
        e = e - jnp.max(e, axis=-1, keepdims=True)
        p = jnp.exp(e)
        p = p * pl.reciprocal(jnp.sum(p, axis=-1, keepdims=True), approx=True)
        att_hm = jnp.dot(p, v, preferred_element_type=jnp.float32)     # (H*NL, D)

        # Unpack head-major rows back to token-major (NL, E).
        att = jnp.concatenate(
            [att_hm[h * NL:(h + 1) * NL, :] for h in range(heads)], axis=1)

        att = jnp.dot(att, wfc, preferred_element_type=jnp.float32) + bfc

        # residual + LayerNorm 1
        h1 = _layernorm(att + x, g1, be1)

        # feed-forward
        ff = jnp.maximum(
            jnp.dot(h1, w1, preferred_element_type=jnp.float32) + bf1, 0.0)
        ff2 = jnp.dot(ff, w2, preferred_element_type=jnp.float32) + bf2

        # residual + LayerNorm 2   (dropout p = 0 -> identity)
        x = _layernorm(ff2 + h1, g2, be2)

    out_ref[...] = x


# ----------------------- wrapper-side param packing -------------------------
def _pad_to_ff(v):
    return jnp.pad(v, ((0, 0), (0, FF_DIM - v.shape[1])))


def pack_pallas_params(params):
    """Stack per-layer weights with a leading layer dim; fold 1/sqrt(E) into Wq."""
    scale = 1.0 / jnp.sqrt(jnp.float32(EMBED_SIZE))
    wqkv, wfc, w1, w2, vecs = [], [], [], [], []
    for lp in params["layers"]:
        wqkv.append(jnp.concatenate(
            [lp["wv_t"], lp["wk_t"], lp["wq_t"] * scale], axis=1))       # (D, 3D)
        wfc.append(lp["wfc_t"])
        w1.append(lp["w1_t"])
        w2.append(lp["w2_t"])
        vecs.append(jnp.concatenate(
            [_pad_to_ff(lp["bfc"]), _pad_to_ff(lp["g1"]), _pad_to_ff(lp["be1"]),
             lp["bf1"], _pad_to_ff(lp["bf2"]), _pad_to_ff(lp["g2"]),
             _pad_to_ff(lp["be2"]), jnp.zeros((1, FF_DIM), jnp.float32)],
            axis=0))                                                      # (8, FF)
    return {
        "wqkv": jnp.stack(wqkv),   # (NUM_LAYERS, D, 3D)
        "wfc": jnp.stack(wfc),     # (NUM_LAYERS, E, E)
        "w1": jnp.stack(w1),       # (NUM_LAYERS, E, FF)
        "w2": jnp.stack(w2),       # (NUM_LAYERS, FF, E)
        "vecs": jnp.stack(vecs),   # (NUM_LAYERS, 8, FF)
    }


def make_attention_mask(tokens):
    """(H*N*L, H*N*L) additive bias for the fused attention.

    0     : same (head, batch) block and the key token is not padding
    -1e20 : same block, padded key (matches masked_fill semantics)
    -2e20 : off-block (different head or batch) -> exp() is exactly 0 even when
            every in-block key is padded (no cross-head/batch leakage).
    """
    N, L = tokens.shape
    NL = N * L
    HNL = HEADS * NL
    r = jnp.arange(HNL)
    h_idx = r // NL
    n_idx = (r // L) % N
    l_idx = r % L
    same_block = (h_idx[:, None] == h_idx[None, :]) & \
                 (n_idx[:, None] == n_idx[None, :])
    key_ok = (tokens != SRC_PAD_IDX)[n_idx, l_idx]                # (HNL,)
    pad_bias = jnp.where(key_ok, 0.0, -1e20)[None, :]             # (1, HNL)
    return jnp.where(same_block, pad_bias, -2e20).astype(jnp.float32)


# --------------------------- full Encoder ----------------------------------
def encoder_pallas(tokens, params, packed):
    N, L = tokens.shape
    E = EMBED_SIZE
    NL = N * L

    tok_flat = tokens.reshape(NL, 1).astype(jnp.int32)
    mask_bias = make_attention_mask(tokens)
    posl = params["pos_emb"][:L]

    kernel = functools.partial(encoder_kernel, heads=HEADS,
                               num_layers=NUM_LAYERS, batch=N, seq=L)
    vmem_spec = lambda: pl.BlockSpec(memory_space=pltpu.MemorySpace.VMEM)
    out2d = pl.pallas_call(
        kernel,
        out_shape=jax.ShapeDtypeStruct((NL, E), jnp.float32),
        in_specs=[vmem_spec() for _ in range(9)],
        out_specs=vmem_spec(),
    )(tok_flat, params["word_emb"], posl, mask_bias,
      packed["wqkv"], packed["wfc"], packed["w1"], packed["w2"], packed["vecs"])
    return out2d.reshape(N, L, E)


# ------------------------ pure-JAX reference -------------------------------
def encoder_reference(tokens, params):
    N, L = tokens.shape
    x = jnp.take(params["word_emb"], tokens, axis=0) + params["pos_emb"][:L][None, :, :]
    mask = (tokens != SRC_PAD_IDX).astype(jnp.float32)               # (N, L)
    for lp in params["layers"]:
        E = x.shape[-1]
        H, D = HEADS, E // HEADS
        xh = x.reshape(N, L, H, D)
        v = xh @ lp["wv_t"]
        k = xh @ lp["wk_t"]
        q = xh @ lp["wq_t"]
        energy = jnp.einsum("nqhd,nkhd->nhqk", q, k)
        energy = jnp.where(mask[:, None, None, :] == 0.0, -1e20, energy)
        attn = jax.nn.softmax(energy / jnp.sqrt(jnp.float32(E)), axis=3)
        att = jnp.einsum("nhqk,nkhd->nqhd", attn, v).reshape(N, L, E)
        att = att @ lp["wfc_t"] + lp["bfc"]
        h1 = _layernorm(att + x, lp["g1"], lp["be1"])
        ff = jax.nn.relu(h1 @ lp["w1_t"] + lp["bf1"]) @ lp["w2_t"] + lp["bf2"]
        x = _layernorm(ff + h1, lp["g2"], lp["be2"])
    return x


# ---------------------- deterministic parameter init -----------------------
def init_params(key):
    E, D, FF = EMBED_SIZE, HEAD_DIM, FF_DIM
    k_emb, k_pos, k_layers = jax.random.split(key, 3)
    params = {
        "word_emb": 0.1 * jax.random.normal(k_emb, (SRC_VOCAB_SIZE, E), jnp.float32),
        "pos_emb": 0.1 * jax.random.normal(k_pos, (MAX_LENGTH, E), jnp.float32),
        "layers": [],
    }
    layer_keys = jax.random.split(k_layers, NUM_LAYERS)
    for lk in layer_keys:
        ks = jax.random.split(lk, 8)
        lp = {
            "wv_t": 0.1 * jax.random.normal(ks[0], (D, D), jnp.float32),
            "wk_t": 0.1 * jax.random.normal(ks[1], (D, D), jnp.float32),
            "wq_t": 0.1 * jax.random.normal(ks[2], (D, D), jnp.float32),
            "wfc_t": 0.1 * jax.random.normal(ks[3], (E, E), jnp.float32),
            "bfc": 0.01 * jax.random.normal(ks[6], (1, E), jnp.float32),
            "g1": jnp.ones((1, E), jnp.float32), "be1": jnp.zeros((1, E), jnp.float32),
            "w1_t": 0.1 * jax.random.normal(ks[4], (E, FF), jnp.float32),
            "bf1": 0.01 * jax.random.normal(ks[7], (1, FF), jnp.float32),
            "w2_t": 0.1 * jax.random.normal(ks[5], (FF, E), jnp.float32),
            "bf2": jnp.zeros((1, E), jnp.float32),
            "g2": jnp.ones((1, E), jnp.float32), "be2": jnp.zeros((1, E), jnp.float32),
        }
        params["layers"].append(lp)
    return params


# TODO(synk): nn.Dropout has p=0 in the reference model construction, so it is
# implemented as identity (no in-kernel RNG needed).
# TODO(synk): on v7x a batch-parallel grid over the second TensorCore could
# halve compute wall; omitted here to keep one code path optimal for v5e/v6e.

if __name__ == "__main__":
    key = jax.random.PRNGKey(0)
    k_tok, k_par = jax.random.split(key)

    N, L = 2, 8
    tokens = jax.random.randint(k_tok, (N, L), 0, SRC_VOCAB_SIZE, dtype=jnp.int32)
    params = init_params(k_par)
    packed = pack_pallas_params(params)

    out = encoder_pallas(tokens, params, packed)
    out = jax.block_until_ready(out)

    ref = encoder_reference(tokens, params)
    assert out.shape == (N, L, EMBED_SIZE)
    assert jnp.max(jnp.abs(out - ref)) < 5e-3, "Pallas output mismatch vs JAX reference"

    print("KERNEL_OK")
</pallas_src>

<mosaic_0001>
module attributes {stable_mosaic.version = 11 : i64} {
  func.func @encoder_kernel(%arg0: memref<16x1xi32, #tpu.memory_space<vmem>>, %arg1: memref<10x32xf32, #tpu.memory_space<vmem>>, %arg2: memref<8x32xf32, #tpu.memory_space<vmem>>, %arg3: memref<64x64xf32, #tpu.memory_space<vmem>>, %arg4: memref<2x8x24xf32, #tpu.memory_space<vmem>>, %arg5: memref<2x32x32xf32, #tpu.memory_space<vmem>>, %arg6: memref<2x32x128xf32, #tpu.memory_space<vmem>>, %arg7: memref<2x128x32xf32, #tpu.memory_space<vmem>>, %arg8: memref<2x8x128xf32, #tpu.memory_space<vmem>>, %arg9: memref<16x32xf32, #tpu.memory_space<vmem>>) attributes {dimension_semantics = [], scalar_prefetch = 0 : i64, scratch_operands = 0 : i64, tpu.core_type = #tpu.core_type<tc>} {
    %c0 = arith.constant 0 : index
    %c0_0 = arith.constant 0 : index
    %0 = vector.load %arg0[%c0, %c0_0] : memref<16x1xi32, #tpu.memory_space<vmem>>, vector<16x1xi32>
    %1 = tpu.iota {dimensions = array<i32: 1>} : vector<16x10xi32>
    %2 = vector.broadcast %0 : vector<16x1xi32> to vector<16x10xi32>
    %3 = arith.cmpi eq, %2, %1 : vector<16x10xi32>
    %4 = arith.extui %3 : vector<16x10xi1> to vector<16x10xi32>
    %5 = arith.sitofp %4 : vector<16x10xi32> to vector<16x10xf32>
    %c0_1 = arith.constant 0 : index
    %c0_2 = arith.constant 0 : index
    %6 = vector.load %arg1[%c0_1, %c0_2] : memref<10x32xf32, #tpu.memory_space<vmem>>, vector<10x32xf32>
    %cst = arith.constant dense<0.000000e+00> : vector<16x32xf32>
    %7 = tpu.matmul %5, %6, %cst {dimension_numbers = #tpu.dot_dimension_numbers<[1], [0], [0], [1], [0, 0, 1, 1], [], []>} : vector<16x10xf32>, vector<10x32xf32>, vector<16x32xf32> -> vector<16x32xf32>
    %c0_3 = arith.constant 0 : index
    %c0_4 = arith.constant 0 : index
    %8 = vector.load %arg2[%c0_3, %c0_4] : memref<8x32xf32, #tpu.memory_space<vmem>>, vector<8x32xf32>
    %9 = tpu.concatenate %8, %8 in 0 : vector<8x32xf32>, vector<8x32xf32> -> vector<16x32xf32>
    %10 = arith.addf %7, %9 : vector<16x32xf32>
    %c0_5 = arith.constant 0 : index
    %c0_6 = arith.constant 0 : index
    %11 = vector.load %arg3[%c0_5, %c0_6] : memref<64x64xf32, #tpu.memory_space<vmem>>, vector<64x64xf32>
    %c0_7 = arith.constant 0 : index
    %c0_8 = arith.constant 0 : index
    %c0_9 = arith.constant 0 : index
    %12 = vector.load %arg4[%c0_7, %c0_8, %c0_9] : memref<2x8x24xf32, #tpu.memory_space<vmem>>, vector<1x8x24xf32>
    %13 = vector.shape_cast %12 : vector<1x8x24xf32> to vector<8x24xf32>
    %c0_10 = arith.constant 0 : index
    %c0_11 = arith.constant 0 : index
    %c0_12 = arith.constant 0 : index
    %14 = vector.load %arg5[%c0_10, %c0_11, %c0_12] : memref<2x32x32xf32, #tpu.memory_space<vmem>>, vector<1x32x32xf32>
    %15 = vector.shape_cast %14 : vector<1x32x32xf32> to vector<32x32xf32>
    %c0_13 = arith.constant 0 : index
    %c0_14 = arith.constant 0 : index
    %c0_15 = arith.constant 0 : index
    %16 = vector.load %arg6[%c0_13, %c0_14, %c0_15] : memref<2x32x128xf32, #tpu.memory_space<vmem>>, vector<1x32x128xf32>
    %17 = vector.shape_cast %16 : vector<1x32x128xf32> to vector<32x128xf32>
    %c0_16 = arith.constant 0 : index
    %c0_17 = arith.constant 0 : index
    %c0_18 = arith.constant 0 : index
    %18 = vector.load %arg7[%c0_16, %c0_17, %c0_18] : memref<2x128x32xf32, #tpu.memory_space<vmem>>, vector<1x128x32xf32>
    %19 = vector.shape_cast %18 : vector<1x128x32xf32> to vector<128x32xf32>
    %c0_19 = arith.constant 0 : index
    %c0_20 = arith.constant 0 : index
    %c0_21 = arith.constant 0 : index
    %20 = vector.load %arg8[%c0_19, %c0_20, %c0_21] : memref<2x8x128xf32, #tpu.memory_space<vmem>>, vector<1x8x128xf32>
    %21 = vector.shape_cast %20 : vector<1x8x128xf32> to vector<8x128xf32>
    %22 = vector.extract_strided_slice %21 {offsets = [0, 0], sizes = [1, 32], strides = [1, 1]} : vector<8x128xf32> to vector<1x32xf32>
    %23 = vector.extract_strided_slice %21 {offsets = [1, 0], sizes = [1, 32], strides = [1, 1]} : vector<8x128xf32> to vector<1x32xf32>
    %24 = vector.extract_strided_slice %21 {offsets = [2, 0], sizes = [1, 32], strides = [1, 1]} : vector<8x128xf32> to vector<1x32xf32>
    %25 = vector.extract_strided_slice %21 {offsets = [3, 0], sizes = [1, 128], strides = [1, 1]} : vector<8x128xf32> to vector<1x128xf32>
    %26 = vector.extract_strided_slice %21 {offsets = [4, 0], sizes = [1, 32], strides = [1, 1]} : vector<8x128xf32> to vector<1x32xf32>
    %27 = vector.extract_strided_slice %21 {offsets = [5, 0], sizes = [1, 32], strides = [1, 1]} : vector<8x128xf32> to vector<1x32xf32>
    %28 = vector.extract_strided_slice %21 {offsets = [6, 0], sizes = [1, 32], strides = [1, 1]} : vector<8x128xf32> to vector<1x32xf32>
    %29 = vector.extract_strided_slice %10 {offsets = [0, 0], sizes = [16, 8], strides = [1, 1]} : vector<16x32xf32> to vector<16x8xf32>
    %30 = vector.extract_strided_slice %10 {offsets = [0, 8], sizes = [16, 8], strides = [1, 1]} : vector<16x32xf32> to vector<16x8xf32>
    %31 = vector.extract_strided_slice %10 {offsets = [0, 16], sizes = [16, 8], strides = [1, 1]} : vector<16x32xf32> to vector<16x8xf32>
    %32 = vector.extract_strided_slice %10 {offsets = [0, 24], sizes = [16, 8], strides = [1, 1]} : vector<16x32xf32> to vector<16x8xf32>
    %33 = tpu.concatenate %29, %30, %31, %32 in 0 : vector<16x8xf32>, vector<16x8xf32>, vector<16x8xf32>, vector<16x8xf32> -> vector<64x8xf32>
    %cst_22 = arith.constant dense<0.000000e+00> : vector<64x24xf32>
    %34 = tpu.matmul %33, %13, %cst_22 {dimension_numbers = #tpu.dot_dimension_numbers<[1], [0], [0], [1], [0, 0, 1, 1], [], []>} : vector<64x8xf32>, vector<8x24xf32>, vector<64x24xf32> -> vector<64x24xf32>
    %35 = vector.extract_strided_slice %34 {offsets = [0, 0], sizes = [64, 8], strides = [1, 1]} : vector<64x24xf32> to vector<64x8xf32>
    %36 = vector.extract_strided_slice %34 {offsets = [0, 8], sizes = [64, 8], strides = [1, 1]} : vector<64x24xf32> to vector<64x8xf32>
    %37 = vector.extract_strided_slice %34 {offsets = [0, 16], sizes = [64, 8], strides = [1, 1]} : vector<64x24xf32> to vector<64x8xf32>
    %cst_23 = arith.constant dense<0.000000e+00> : vector<64x64xf32>
    %38 = tpu.matmul %37, %36, %cst_23 {dimension_numbers = #tpu.dot_dimension_numbers<[1], [1], [0], [0], [0, 0, 1, 0], [], []>} : vector<64x8xf32>, vector<64x8xf32>, vector<64x64xf32> -> vector<64x64xf32>
    %39 = arith.addf %38, %11 : vector<64x64xf32>
    %cst_24 = arith.constant dense<0xFF800000> : vector<64xf32>
    %40 = vector.multi_reduction <maximumf>, %39, %cst_24 [1] : vector<64x64xf32> to vector<64xf32>
    %41 = vector.shape_cast %40 : vector<64xf32> to vector<64x1xf32>
    %42 = vector.broadcast %41 : vector<64x1xf32> to vector<64x64xf32>
    %43 = arith.subf %39, %42 : vector<64x64xf32>
    %44 = math.exp %43 : vector<64x64xf32>
    %cst_25 = arith.constant dense<0.000000e+00> : vector<64xf32>
    %45 = vector.multi_reduction <add>, %44, %cst_25 [1] : vector<64x64xf32> to vector<64xf32>
    %46 = vector.shape_cast %45 : vector<64xf32> to vector<64x1xf32>
    %47 = tpu.reciprocal %46 {approx = true} : vector<64x1xf32> -> vector<64x1xf32>
    %48 = vector.broadcast %47 : vector<64x1xf32> to vector<64x64xf32>
    %49 = arith.mulf %44, %48 : vector<64x64xf32>
    %cst_26 = arith.constant dense<0.000000e+00> : vector<64x8xf32>
    %50 = tpu.matmul %49, %35, %cst_26 {dimension_numbers = #tpu.dot_dimension_numbers<[1], [0], [0], [1], [0, 0, 1, 1], [], []>} : vector<64x64xf32>, vector<64x8xf32>, vector<64x8xf32> -> vector<64x8xf32>
    %51 = vector.extract_strided_slice %50 {offsets = [0, 0], sizes = [16, 8], strides = [1, 1]} : vector<64x8xf32> to vector<16x8xf32>
    %52 = vector.extract_strided_slice %50 {offsets = [16, 0], sizes = [16, 8], strides = [1, 1]} : vector<64x8xf32> to vector<16x8xf32>
    %53 = vector.extract_strided_slice %50 {offsets = [32, 0], sizes = [16, 8], strides = [1, 1]} : vector<64x8xf32> to vector<16x8xf32>
    %54 = vector.extract_strided_slice %50 {offsets = [48, 0], sizes = [16, 8], strides = [1, 1]} : vector<64x8xf32> to vector<16x8xf32>
    %55 = tpu.concatenate %51, %52, %53, %54 in 1 : vector<16x8xf32>, vector<16x8xf32>, vector<16x8xf32>, vector<16x8xf32> -> vector<16x32xf32>
    %cst_27 = arith.constant dense<0.000000e+00> : vector<16x32xf32>
    %56 = tpu.matmul %55, %15, %cst_27 {dimension_numbers = #tpu.dot_dimension_numbers<[1], [0], [0], [1], [0, 0, 1, 1], [], []>} : vector<16x32xf32>, vector<32x32xf32>, vector<16x32xf32> -> vector<16x32xf32>
    %57 = vector.broadcast %22 : vector<1x32xf32> to vector<16x32xf32>
    %58 = arith.addf %56, %57 : vector<16x32xf32>
    %59 = arith.addf %58, %10 : vector<16x32xf32>
    %cst_28 = arith.constant dense<0.000000e+00> : vector<16xf32>
    %60 = vector.multi_reduction <add>, %59, %cst_28 [1] : vector<16x32xf32> to vector<16xf32>
    %61 = vector.shape_cast %60 : vector<16xf32> to vector<16x1xf32>
    %cst_29 = arith.constant 3.200000e+01 : f32
    %62 = vector.broadcast %cst_29 : f32 to vector<16x1xf32>
    %63 = arith.divf %61, %62 : vector<16x1xf32>
    %64 = vector.broadcast %63 : vector<16x1xf32> to vector<16x32xf32>
    %65 = arith.subf %59, %64 : vector<16x32xf32>
    %66 = arith.mulf %65, %65 : vector<16x32xf32>
    %cst_30 = arith.constant dense<0.000000e+00> : vector<16xf32>
    %67 = vector.multi_reduction <add>, %66, %cst_30 [1] : vector<16x32xf32> to vector<16xf32>
    %68 = vector.shape_cast %67 : vector<16xf32> to vector<16x1xf32>
    %cst_31 = arith.constant 3.200000e+01 : f32
    %69 = vector.broadcast %cst_31 : f32 to vector<16x1xf32>
    %70 = arith.divf %68, %69 : vector<16x1xf32>
    %71 = vector.broadcast %63 : vector<16x1xf32> to vector<16x32xf32>
    %72 = arith.subf %59, %71 : vector<16x32xf32>
    %cst_32 = arith.constant 9.99999974E-6 : f32
    %73 = vector.broadcast %cst_32 : f32 to vector<16x1xf32>
    %74 = arith.addf %70, %73 : vector<16x1xf32>
    %75 = math.rsqrt %74 : vector<16x1xf32>
    %76 = vector.broadcast %75 : vector<16x1xf32> to vector<16x32xf32>
    %77 = arith.mulf %72, %76 : vector<16x32xf32>
    %78 = vector.broadcast %23 : vector<1x32xf32> to vector<16x32xf32>
    %79 = arith.mulf %77, %78 : vector<16x32xf32>
    %80 = vector.broadcast %24 : vector<1x32xf32> to vector<16x32xf32>
    %81 = arith.addf %79, %80 : vector<16x32xf32>
    %cst_33 = arith.constant dense<0.000000e+00> : vector<16x128xf32>
    %82 = tpu.matmul %81, %17, %cst_33 {dimension_numbers = #tpu.dot_dimension_numbers<[1], [0], [0], [1], [0, 0, 1, 1], [], []>} : vector<16x32xf32>, vector<32x128xf32>, vector<16x128xf32> -> vector<16x128xf32>
    %83 = vector.broadcast %25 : vector<1x128xf32> to vector<16x128xf32>
    %84 = arith.addf %82, %83 : vector<16x128xf32>
    %cst_34 = arith.constant 0.000000e+00 : f32
    %85 = vector.broadcast %cst_34 : f32 to vector<16x128xf32>
    %86 = arith.maximumf %84, %85 : vector<16x128xf32>
    %cst_35 = arith.constant dense<0.000000e+00> : vector<16x32xf32>
    %87 = tpu.matmul %86, %19, %cst_35 {dimension_numbers = #tpu.dot_dimension_numbers<[1], [0], [0], [1], [0, 0, 1, 1], [], []>} : vector<16x128xf32>, vector<128x32xf32>, vector<16x32xf32> -> vector<16x32xf32>
    %88 = vector.broadcast %26 : vector<1x32xf32> to vector<16x32xf32>
    %89 = arith.addf %87, %88 : vector<16x32xf32>
    %90 = arith.addf %89, %81 : vector<16x32xf32>
    %cst_36 = arith.constant dense<0.000000e+00> : vector<16xf32>
    %91 = vector.multi_reduction <add>, %90, %cst_36 [1] : vector<16x32xf32> to vector<16xf32>
    %92 = vector.shape_cast %91 : vector<16xf32> to vector<16x1xf32>
    %cst_37 = arith.constant 3.200000e+01 : f32
    %93 = vector.broadcast %cst_37 : f32 to vector<16x1xf32>
    %94 = arith.divf %92, %93 : vector<16x1xf32>
    %95 = vector.broadcast %94 : vector<16x1xf32> to vector<16x32xf32>
    %96 = arith.subf %90, %95 : vector<16x32xf32>
    %97 = arith.mulf %96, %96 : vector<16x32xf32>
    %cst_38 = arith.constant dense<0.000000e+00> : vector<16xf32>
    %98 = vector.multi_reduction <add>, %97, %cst_38 [1] : vector<16x32xf32> to vector<16xf32>
    %99 = vector.shape_cast %98 : vector<16xf32> to vector<16x1xf32>
    %cst_39 = arith.constant 3.200000e+01 : f32
    %100 = vector.broadcast %cst_39 : f32 to vector<16x1xf32>
    %101 = arith.divf %99, %100 : vector<16x1xf32>
    %102 = vector.broadcast %94 : vector<16x1xf32> to vector<16x32xf32>
    %103 = arith.subf %90, %102 : vector<16x32xf32>
    %cst_40 = arith.constant 9.99999974E-6 : f32
    %104 = vector.broadcast %cst_40 : f32 to vector<16x1xf32>
    %105 = arith.addf %101, %104 : vector<16x1xf32>
    %106 = math.rsqrt %105 : vector<16x1xf32>
    %107 = vector.broadcast %106 : vector<16x1xf32> to vector<16x32xf32>
    %108 = arith.mulf %103, %107 : vector<16x32xf32>
    %109 = vector.broadcast %27 : vector<1x32xf32> to vector<16x32xf32>
    %110 = arith.mulf %108, %109 : vector<16x32xf32>
    %111 = vector.broadcast %28 : vector<1x32xf32> to vector<16x32xf32>
    %112 = arith.addf %110, %111 : vector<16x32xf32>
    %c1 = arith.constant 1 : index
    %c0_41 = arith.constant 0 : index
    %c0_42 = arith.constant 0 : index
    %113 = vector.load %arg4[%c1, %c0_41, %c0_42] : memref<2x8x24xf32, #tpu.memory_space<vmem>>, vector<1x8x24xf32>
    %114 = vector.shape_cast %113 : vector<1x8x24xf32> to vector<8x24xf32>
    %c1_43 = arith.constant 1 : index
    %c0_44 = arith.constant 0 : index
    %c0_45 = arith.constant 0 : index
    %115 = vector.load %arg5[%c1_43, %c0_44, %c0_45] : memref<2x32x32xf32, #tpu.memory_space<vmem>>, vector<1x32x32xf32>
    %116 = vector.shape_cast %115 : vector<1x32x32xf32> to vector<32x32xf32>
    %c1_46 = arith.constant 1 : index
    %c0_47 = arith.constant 0 : index
    %c0_48 = arith.constant 0 : index
    %117 = vector.load %arg6[%c1_46, %c0_47, %c0_48] : memref<2x32x128xf32, #tpu.memory_space<vmem>>, vector<1x32x128xf32>
    %118 = vector.shape_cast %117 : vector<1x32x128xf32> to vector<32x128xf32>
    %c1_49 = arith.constant 1 : index
    %c0_50 = arith.constant 0 : index
    %c0_51 = arith.constant 0 : index
    %119 = vector.load %arg7[%c1_49, %c0_50, %c0_51] : memref<2x128x32xf32, #tpu.memory_space<vmem>>, vector<1x128x32xf32>
    %120 = vector.shape_cast %119 : vector<1x128x32xf32> to vector<128x32xf32>
    %c1_52 = arith.constant 1 : index
    %c0_53 = arith.constant 0 : index
    %c0_54 = arith.constant 0 : index
    %121 = vector.load %arg8[%c1_52, %c0_53, %c0_54] : memref<2x8x128xf32, #tpu.memory_space<vmem>>, vector<1x8x128xf32>
    %122 = vector.shape_cast %121 : vector<1x8x128xf32> to vector<8x128xf32>
    %123 = vector.extract_strided_slice %122 {offsets = [0, 0], sizes = [1, 32], strides = [1, 1]} : vector<8x128xf32> to vector<1x32xf32>
    %124 = vector.extract_strided_slice %122 {offsets = [1, 0], sizes = [1, 32], strides = [1, 1]} : vector<8x128xf32> to vector<1x32xf32>
    %125 = vector.extract_strided_slice %122 {offsets = [2, 0], sizes = [1, 32], strides = [1, 1]} : vector<8x128xf32> to vector<1x32xf32>
    %126 = vector.extract_strided_slice %122 {offsets = [3, 0], sizes = [1, 128], strides = [1, 1]} : vector<8x128xf32> to vector<1x128xf32>
    %127 = vector.extract_strided_slice %122 {offsets = [4, 0], sizes = [1, 32], strides = [1, 1]} : vector<8x128xf32> to vector<1x32xf32>
    %128 = vector.extract_strided_slice %122 {offsets = [5, 0], sizes = [1, 32], strides = [1, 1]} : vector<8x128xf32> to vector<1x32xf32>
    %129 = vector.extract_strided_slice %122 {offsets = [6, 0], sizes = [1, 32], strides = [1, 1]} : vector<8x128xf32> to vector<1x32xf32>
    %130 = vector.extract_strided_slice %112 {offsets = [0, 0], sizes = [16, 8], strides = [1, 1]} : vector<16x32xf32> to vector<16x8xf32>
    %131 = vector.extract_strided_slice %112 {offsets = [0, 8], sizes = [16, 8], strides = [1, 1]} : vector<16x32xf32> to vector<16x8xf32>
    %132 = vector.extract_strided_slice %112 {offsets = [0, 16], sizes = [16, 8], strides = [1, 1]} : vector<16x32xf32> to vector<16x8xf32>
    %133 = vector.extract_strided_slice %112 {offsets = [0, 24], sizes = [16, 8], strides = [1, 1]} : vector<16x32xf32> to vector<16x8xf32>
    %134 = tpu.concatenate %130, %131, %132, %133 in 0 : vector<16x8xf32>, vector<16x8xf32>, vector<16x8xf32>, vector<16x8xf32> -> vector<64x8xf32>
    %cst_55 = arith.constant dense<0.000000e+00> : vector<64x24xf32>
    %135 = tpu.matmul %134, %114, %cst_55 {dimension_numbers = #tpu.dot_dimension_numbers<[1], [0], [0], [1], [0, 0, 1, 1], [], []>} : vector<64x8xf32>, vector<8x24xf32>, vector<64x24xf32> -> vector<64x24xf32>
    %136 = vector.extract_strided_slice %135 {offsets = [0, 0], sizes = [64, 8], strides = [1, 1]} : vector<64x24xf32> to vector<64x8xf32>
    %137 = vector.extract_strided_slice %135 {offsets = [0, 8], sizes = [64, 8], strides = [1, 1]} : vector<64x24xf32> to vector<64x8xf32>
    %138 = vector.extract_strided_slice %135 {offsets = [0, 16], sizes = [64, 8], strides = [1, 1]} : vector<64x24xf32> to vector<64x8xf32>
    %cst_56 = arith.constant dense<0.000000e+00> : vector<64x64xf32>
    %139 = tpu.matmul %138, %137, %cst_56 {dimension_numbers = #tpu.dot_dimension_numbers<[1], [1], [0], [0], [0, 0, 1, 0], [], []>} : vector<64x8xf32>, vector<64x8xf32>, vector<64x64xf32> -> vector<64x64xf32>
    %140 = arith.addf %139, %11 : vector<64x64xf32>
    %cst_57 = arith.constant dense<0xFF800000> : vector<64xf32>
    %141 = vector.multi_reduction <maximumf>, %140, %cst_57 [1] : vector<64x64xf32> to vector<64xf32>
    %142 = vector.shape_cast %141 : vector<64xf32> to vector<64x1xf32>
    %143 = vector.broadcast %142 : vector<64x1xf32> to vector<64x64xf32>
    %144 = arith.subf %140, %143 : vector<64x64xf32>
    %145 = math.exp %144 : vector<64x64xf32>
    %cst_58 = arith.constant dense<0.000000e+00> : vector<64xf32>
    %146 = vector.multi_reduction <add>, %145, %cst_58 [1] : vector<64x64xf32> to vector<64xf32>
    %147 = vector.shape_cast %146 : vector<64xf32> to vector<64x1xf32>
    %148 = tpu.reciprocal %147 {approx = true} : vector<64x1xf32> -> vector<64x1xf32>
    %149 = vector.broadcast %148 : vector<64x1xf32> to vector<64x64xf32>
    %150 = arith.mulf %145, %149 : vector<64x64xf32>
    %cst_59 = arith.constant dense<0.000000e+00> : vector<64x8xf32>
    %151 = tpu.matmul %150, %136, %cst_59 {dimension_numbers = #tpu.dot_dimension_numbers<[1], [0], [0], [1], [0, 0, 1, 1], [], []>} : vector<64x64xf32>, vector<64x8xf32>, vector<64x8xf32> -> vector<64x8xf32>
    %152 = vector.extract_strided_slice %151 {offsets = [0, 0], sizes = [16, 8], strides = [1, 1]} : vector<64x8xf32> to vector<16x8xf32>
    %153 = vector.extract_strided_slice %151 {offsets = [16, 0], sizes = [16, 8], strides = [1, 1]} : vector<64x8xf32> to vector<16x8xf32>
    %154 = vector.extract_strided_slice %151 {offsets = [32, 0], sizes = [16, 8], strides = [1, 1]} : vector<64x8xf32> to vector<16x8xf32>
    %155 = vector.extract_strided_slice %151 {offsets = [48, 0], sizes = [16, 8], strides = [1, 1]} : vector<64x8xf32> to vector<16x8xf32>
    %156 = tpu.concatenate %152, %153, %154, %155 in 1 : vector<16x8xf32>, vector<16x8xf32>, vector<16x8xf32>, vector<16x8xf32> -> vector<16x32xf32>
    %cst_60 = arith.constant dense<0.000000e+00> : vector<16x32xf32>
    %157 = tpu.matmul %156, %116, %cst_60 {dimension_numbers = #tpu.dot_dimension_numbers<[1], [0], [0], [1], [0, 0, 1, 1], [], []>} : vector<16x32xf32>, vector<32x32xf32>, vector<16x32xf32> -> vector<16x32xf32>
    %158 = vector.broadcast %123 : vector<1x32xf32> to vector<16x32xf32>
    %159 = arith.addf %157, %158 : vector<16x32xf32>
    %160 = arith.addf %159, %112 : vector<16x32xf32>
    %cst_61 = arith.constant dense<0.000000e+00> : vector<16xf32>
    %161 = vector.multi_reduction <add>, %160, %cst_61 [1] : vector<16x32xf32> to vector<16xf32>
    %162 = vector.shape_cast %161 : vector<16xf32> to vector<16x1xf32>
    %cst_62 = arith.constant 3.200000e+01 : f32
    %163 = vector.broadcast %cst_62 : f32 to vector<16x1xf32>
    %164 = arith.divf %162, %163 : vector<16x1xf32>
    %165 = vector.broadcast %164 : vector<16x1xf32> to vector<16x32xf32>
    %166 = arith.subf %160, %165 : vector<16x32xf32>
    %167 = arith.mulf %166, %166 : vector<16x32xf32>
    %cst_63 = arith.constant dense<0.000000e+00> : vector<16xf32>
    %168 = vector.multi_reduction <add>, %167, %cst_63 [1] : vector<16x32xf32> to vector<16xf32>
    %169 = vector.shape_cast %168 : vector<16xf32> to vector<16x1xf32>
    %cst_64 = arith.constant 3.200000e+01 : f32
    %170 = vector.broadcast %cst_64 : f32 to vector<16x1xf32>
    %171 = arith.divf %169, %170 : vector<16x1xf32>
    %172 = vector.broadcast %164 : vector<16x1xf32> to vector<16x32xf32>
    %173 = arith.subf %160, %172 : vector<16x32xf32>
    %cst_65 = arith.constant 9.99999974E-6 : f32
    %174 = vector.broadcast %cst_65 : f32 to vector<16x1xf32>
    %175 = arith.addf %171, %174 : vector<16x1xf32>
    %176 = math.rsqrt %175 : vector<16x1xf32>
    %177 = vector.broadcast %176 : vector<16x1xf32> to vector<16x32xf32>
    %178 = arith.mulf %173, %177 : vector<16x32xf32>
    %179 = vector.broadcast %124 : vector<1x32xf32> to vector<16x32xf32>
    %180 = arith.mulf %178, %179 : vector<16x32xf32>
    %181 = vector.broadcast %125 : vector<1x32xf32> to vector<16x32xf32>
    %182 = arith.addf %180, %181 : vector<16x32xf32>
    %cst_66 = arith.constant dense<0.000000e+00> : vector<16x128xf32>
    %183 = tpu.matmul %182, %118, %cst_66 {dimension_numbers = #tpu.dot_dimension_numbers<[1], [0], [0], [1], [0, 0, 1, 1], [], []>} : vector<16x32xf32>, vector<32x128xf32>, vector<16x128xf32> -> vector<16x128xf32>
    %184 = vector.broadcast %126 : vector<1x128xf32> to vector<16x128xf32>
    %185 = arith.addf %183, %184 : vector<16x128xf32>
    %cst_67 = arith.constant 0.000000e+00 : f32
    %186 = vector.broadcast %cst_67 : f32 to vector<16x128xf32>
    %187 = arith.maximumf %185, %186 : vector<16x128xf32>
    %cst_68 = arith.constant dense<0.000000e+00> : vector<16x32xf32>
    %188 = tpu.matmul %187, %120, %cst_68 {dimension_numbers = #tpu.dot_dimension_numbers<[1], [0], [0], [1], [0, 0, 1, 1], [], []>} : vector<16x128xf32>, vector<128x32xf32>, vector<16x32xf32> -> vector<16x32xf32>
    %189 = vector.broadcast %127 : vector<1x32xf32> to vector<16x32xf32>
    %190 = arith.addf %188, %189 : vector<16x32xf32>
    %191 = arith.addf %190, %182 : vector<16x32xf32>
    %cst_69 = arith.constant dense<0.000000e+00> : vector<16xf32>
    %192 = vector.multi_reduction <add>, %191, %cst_69 [1] : vector<16x32xf32> to vector<16xf32>
    %193 = vector.shape_cast %192 : vector<16xf32> to vector<16x1xf32>
    %cst_70 = arith.constant 3.200000e+01 : f32
    %194 = vector.broadcast %cst_70 : f32 to vector<16x1xf32>
    %195 = arith.divf %193, %194 : vector<16x1xf32>
    %196 = vector.broadcast %195 : vector<16x1xf32> to vector<16x32xf32>
    %197 = arith.subf %191, %196 : vector<16x32xf32>
    %198 = arith.mulf %197, %197 : vector<16x32xf32>
    %cst_71 = arith.constant dense<0.000000e+00> : vector<16xf32>
    %199 = vector.multi_reduction <add>, %198, %cst_71 [1] : vector<16x32xf32> to vector<16xf32>
    %200 = vector.shape_cast %199 : vector<16xf32> to vector<16x1xf32>
    %cst_72 = arith.constant 3.200000e+01 : f32
    %201 = vector.broadcast %cst_72 : f32 to vector<16x1xf32>
    %202 = arith.divf %200, %201 : vector<16x1xf32>
    %203 = vector.broadcast %195 : vector<16x1xf32> to vector<16x32xf32>
    %204 = arith.subf %191, %203 : vector<16x32xf32>
    %cst_73 = arith.constant 9.99999974E-6 : f32
    %205 = vector.broadcast %cst_73 : f32 to vector<16x1xf32>
    %206 = arith.addf %202, %205 : vector<16x1xf32>
    %207 = math.rsqrt %206 : vector<16x1xf32>
    %208 = vector.broadcast %207 : vector<16x1xf32> to vector<16x32xf32>
    %209 = arith.mulf %204, %208 : vector<16x32xf32>
    %210 = vector.broadcast %128 : vector<1x32xf32> to vector<16x32xf32>
    %211 = arith.mulf %209, %210 : vector<16x32xf32>
    %212 = vector.broadcast %129 : vector<1x32xf32> to vector<16x32xf32>
    %213 = arith.addf %211, %212 : vector<16x32xf32>
    %c0_74 = arith.constant 0 : index
    %c0_75 = arith.constant 0 : index
    %214 = vector.load %arg9[%c0_74, %c0_75] : memref<16x32xf32, #tpu.memory_space<vmem>>, vector<16x32xf32>
    tpu.vector_store %arg9[%c0_74, %c0_75], %213 {strides = array<i32>} : memref<16x32xf32, #tpu.memory_space<vmem>>, vector<16x32xf32>,
    return
  }
}

</mosaic_0001>

<bundles_post_ra>
// kernel: tpu_custom_call.1
= control target key start
LH: loop header
LB: loop body
LE: loop exit
PB: predicated region body
PF: predicated region fallthrough
CT: control target
= control target key end

     0   :  { %s3460_s0 = inlined_call_operand.vmem [shape: s32[16,1], index: 0, kind: input, shape index: {}]   ;;  %s3461_s1 = inlined_call_operand.vmem [shape: f32[10,32], index: 1, kind: input, shape index: {}]   ;;  %s3462_s2 = inlined_call_operand.vmem [shape: f32[8,32], index: 2, kind: input, shape index: {}]   ;;  %s3463_s3 = inlined_call_operand.vmem [shape: f32[64,64], index: 3, kind: input, shape index: {}]   ;;  %s3464_s4 = inlined_call_operand.vmem [shape: f32[2,8,24], index: 4, kind: input, shape index: {}]   ;;  %s3465_s5 = inlined_call_operand.vmem [shape: f32[2,32,32], index: 5, kind: input, shape index: {}]   ;;  %s3466_s6 = inlined_call_operand.vmem [shape: f32[2,32,128], index: 6, kind: input, shape index: {}]   ;;  %s3467_s7 = inlined_call_operand.vmem [shape: f32[2,128,32], index: 7, kind: input, shape index: {}]   ;;  %s3468_s8 = inlined_call_operand.vmem [shape: f32[2,8,128], index: 8, kind: input, shape index: {}]   ;;  %s3469_s9 = inlined_call_operand.hbm [shape: f32[16,32], index: 9, kind: output, shape index: {}]  }
   0x1   :  { %v33_v0 = vld [vmem:[%s3460_s0] sm:$0xff] }
   0x2   :  { %14 = vsyncpa [#allocation3], 0  ;;  %v2855_v1 = vmov 0   ;;  %v49_v2 = vld [vmem:[%s3461_s1] sm:$0xff]  ;;  %v50_v3 = vld [vmem:[%s3461_s1 + $0x8] sm:$0x3]  ;;  %v35_v6 = vlaneseq }
   0x3   :  { %2710 = vset.pattern.permute.xlu0 %v2855_v1  ;;  %vm59_vm0 = vcmask 1041408   ;;  %v2517_v4 = vpack.c.bf16 %v50_v3, %v49_v2  ;;  %vm2856_vm1 = vmmov 1   ;;  %v34_v5 = vld [vmem:[%s3460_s0 + $0x8] sm:$0xff]  ;;  %vm52_vm3 = vcmask 80896   ;;  %v146_v13 = vld [vmem:[%s3464_s4] sm:$0xff]  ;;  %s2858_s19 = smov 112  }
   0x4   :  { %38 = vperm.xlu0 %2710, %v33_v0   ;;  %vm2518_vm2 = vmpackc.low %vm59_vm0, %vm2856_vm1  ;;  %v36_v7 = vand.u32 127, %v35_v6  ;;  %v2857_v9 = vmov 0.0   ;;  %2263 = vmatprep.subr.mxu1 %v146_v13  ;;  %v51_v14 = vld [vmem:[%s3462_s2] sm:$0xff]  ;;  %vm186_vm6 = vcmask 64512   ;;  %s2859_s20 = smov 120   ;;  %s2860_s2 = smov 104  }
   0x5   :  { %2519 = vmatprep.subr.msk.bf16.mxu0 %vm2518_vm2, %v2517_v4  ;;  %2264 = vmatpush3.msra.mxu1 %v146_v13  ;;  %vm2964_vm7 = vmpackc.low %vm186_vm6, %vm186_vm6  ;;  %v3006_v2 = vld [vmem:[%s3463_s3 + $0x8] sm:$0xff]  ;;  %v3011_v3 = vld [vmem:[%s3463_s3] sm:$0xff]  ;;  %vm485_vm8 = vcmask 523264   ;;  %s2861_s23 = smov 8   ;;  %s2862_s24 = smov 16   ;;  %vm732_vm9 = vcmask 195584  }
   0x6   :  { %2522 = vmatpush3.bf16.msk.msra.mxu0 %vm2518_vm2, %v2517_v4  ;;  %v3025_v13 = vld [vmem:[%s3463_s3 + $0x18] sm:$0xff]  ;;  %s2863_s25 = smov 24   ;;  %vm729_vm10 = vcmask 130048   ;;  %vm739_vm11 = vcmask 261120  }
   0x8   :  { %41 = vperm.xlu0 %2710, %v34_v5  }
  0x83   :  { %v39_v8 = vpop.permute.xlu0 %38 }
  0x84   :  { %vm43_vm4 = vcmp.eq.s32.totalorder %v39_v8, %v36_v7 }
  0x85   :  { %v2007_v10 = vsel %vm43_vm4, 1.0, %v2857_v9 }
  0x86   :  { %2260 = vmatprep.mubr.msk.f32.mxu0 %vm52_vm3, %v2007_v10  ;;  %v3019_v10 = vld [vmem:[%s3463_s3 + $0x10] sm:$0xff] }
  0x87   :  { %v42_v11 = vpop.permute.xlu0 %41 }
  0x88   :  { %vm44_vm5 = vcmp.eq.s32.totalorder %v42_v11, %v36_v7 }
  0x89   :  { %v2008_v12 = vsel %vm44_vm5, 1.0, %v2857_v9 }
  0x8a   :  { %2261 = vmatmul.mubr.msk.f32.vlgmr.msra.gmra.mrb[0].mxu0 %vm52_vm3, %v2008_v12 }
 0x15d   :  { %v2262_v15 = vpop.f32.mrb[0].mxu0 }
 0x15e   :  { %v129_v16 = vpop.f32.mrb[1].mxu0  ;;  %v2937_v18 = vadd.f32 %v2262_v15, %v51_v14 }
 0x15f   :  { %v2935_v17 = vadd.f32 %v129_v16, %v51_v14  ;;  %v3031_v16 = vld [vmem:[%s3463_s3 + $0x20] sm:$0xff] }
 0x161   :  { %178 = vrot.lane.b32.xlu0 %v2935_v17, %s2858_s19  ;;  %174 = vrot.lane.b32.xlu1 %v2935_v17, %s2859_s20 }
 0x162   :  { %2265 = vmatprep.mubr.msk.f32.mxu1 %vm186_vm6, %v2935_v17 }
 0x163   :  { %2266 = vmatmul.mubr.msk.f32.vlgmr.msra.gmra.mrb[0].mxu1 %vm186_vm6, %v2937_v18 }
 0x165   :  { %182 = vrot.lane.b32.xlu0 %v2935_v17, %s2860_s2  ;;  %176 = vrot.lane.b32.xlu1 %v2937_v18, %s2859_s20 }
 0x169   :  { %180 = vrot.lane.b32.xlu1 %v2937_v18, %s2858_s19 }
 0x16d   :  { %184 = vrot.lane.b32.xlu1 %v2937_v18, %s2860_s2 }
 0x1d3   :  { %v175_v19 = vpop.permute.xlu1 %174  ;;  %v179_v20 = vpop.permute.xlu0 %178 }
 0x1d4   :  { %2268 = vmatprep.mubr.msk.f32.mxu1 %vm186_vm6, %v175_v19 }
 0x1d7   :  { %v177_v21 = vpop.permute.xlu1 %176  ;;  %v183_v23 = vpop.permute.xlu0 %182 }
 0x1d8   :  { %2269 = vmatmul.mubr.msk.f32.gmra.mrb[2].mxu1 %vm186_vm6, %v177_v21 }
 0x1d9   :  { %2271 = vmatprep.mubr.msk.f32.mxu1 %vm186_vm6, %v179_v20 }
 0x1db   :  { %v181_v22 = vpop.permute.xlu1 %180 }
 0x1dc   :  { %2272 = vmatmul.mubr.msk.f32.gmra.mrb[4].mxu1 %vm186_vm6, %v181_v22  ;;  %v3038_v22 = vld [vmem:[%s3463_s3 + $0x28] sm:$0xff] }
 0x1dd   :  { %2274 = vmatprep.mubr.msk.f32.mxu1 %vm186_vm6, %v183_v23 }
 0x1df   :  { %v185_v24 = vpop.permute.xlu1 %184 }
 0x1e0   :  { %2275 = vmatmul.mubr.msk.f32.gmra.mrb[6].mxu1 %vm186_vm6, %v185_v24 }
 0x236   :  { %v2267_v25 = vpop.f32.mrb[0].mxu1 }
 0x237   :  { %v269_v26 = vpop.f32.mrb[1].mxu1 }
 0x238   :  { %v2711_v27 = vpack.i.bf16 %v2267_v25, %v269_v26  ;;  %v2547_v28 = vpack.c.bf16 %v2267_v25, %v269_v26 }
 0x23a   :  { %2712 = vrot.lane.b32.xlu0 %v2711_v27, %s2859_s20  ;;  %2548 = vmatprep.subr.bf16.mxu0 %v2547_v28 }
 0x23b   :  { %2550 = vmatpush3.bf16.msra.mxu0 %v2547_v28 }
 0x2ab   :  { %v2270_v29 = vpop.f32.mrb[2].mxu1 }
 0x2ac   :  { %v2713_v30 = vpop.permute.xlu0 %2712  ;;  %v279_v31 = vpop.f32.mrb[3].mxu1 }
 0x2ad   :  { %v2715_v32 = vunpack.i.h.bf16 %v2713_v30  ;;  %v2714_v33 = vunpack.i.l.bf16 %v2713_v30  ;;  %v2716_v34 = vpack.i.bf16 %v2270_v29, %v279_v31  ;;  %v2551_v35 = vpack.c.bf16 %v2270_v29, %v279_v31  ;;  %v3052_v30 = vld [vmem:[%s3463_s3 + $0x38] sm:$0xff] }
 0x2af   :  { %v2523_v37 = vpack.c.bf16 %v2715_v32, %v2714_v33  ;;  %2717 = vrot.lane.b32.xlu1 %v2716_v34, %s2859_s20  ;;  %v2273_v38 = vpop.f32.mrb[4].mxu1  ;;  %2552 = vmatprep.subr.bf16.mxu0 %v2551_v35 }
 0x2b0   :  { %v289_v39 = vpop.f32.mrb[5].mxu1  ;;  %2554 = vmatpush3.bf16.msra.mxu0 %v2551_v35 }
 0x2b1   :  { %v2721_v40 = vpack.i.bf16 %v2273_v38, %v289_v39  ;;  %v2555_v41 = vpack.c.bf16 %v2273_v38, %v289_v39  ;;  %2525 = vmatprep.subr.msk.bf16.mxu1 %vm2964_vm7, %v2523_v37 }
 0x2b2   :  { %2528 = vmatpush3.bf16.xpose.msk.msra.mxu1 %vm2964_vm7, %v2523_v37 }
 0x2b3   :  { %2722 = vrot.lane.b32.xlu0 %v2721_v40, %s2859_s20  ;;  %v2276_v42 = vpop.f32.mrb[6].mxu1  ;;  %2556 = vmatprep.subr.bf16.mxu0 %v2555_v41 }
 0x2b4   :  { %v299_v43 = vpop.f32.mrb[7].mxu1  ;;  %2558 = vmatpush3.bf16.msra.mxu0 %v2555_v41 }
 0x2b5   :  { %v2726_v44 = vpack.i.bf16 %v2276_v42, %v299_v43  ;;  %v2559_v45 = vpack.c.bf16 %v2276_v42, %v299_v43 }
 0x2b7   :  { %316 = vrot.lane.b32.xlu0 %v269_v26, %s2858_s19  ;;  %2727 = vrot.lane.b32.xlu1 %v2726_v44, %s2859_s20 }
 0x2b8   :  { %2560 = vmatprep.subr.bf16.mxu0 %v2559_v45 }
 0x2b9   :  { %2562 = vmatpush3.bf16.msra.mxu0 %v2559_v45 }
 0x2bb   :  { %320 = vrot.lane.b32.xlu0 %v279_v31, %s2858_s19  ;;  %318 = vrot.lane.b32.xlu1 %v2267_v25, %s2858_s19  ;;  %v3044_v25 = vld [vmem:[%s3463_s3 + $0x30] sm:$0xff] }
 0x2bf   :  { %324 = vrot.lane.b32.xlu0 %v289_v39, %s2858_s19  ;;  %322 = vrot.lane.b32.xlu1 %v2270_v29, %s2858_s19 }
 0x2c3   :  { %328 = vrot.lane.b32.xlu0 %v299_v43, %s2858_s19  ;;  %326 = vrot.lane.b32.xlu1 %v2273_v38, %s2858_s19 }
 0x2c7   :  { %330 = vrot.lane.b32.xlu1 %v2276_v42, %s2858_s19 }
 0x321   :  { %v2718_v46 = vpop.permute.xlu1 %2717 }
 0x322   :  { %v2720_v47 = vunpack.i.h.bf16 %v2718_v46  ;;  %v2719_v48 = vunpack.i.l.bf16 %v2718_v46 }
 0x324   :  { %v2529_v49 = vpack.c.bf16 %v2720_v47, %v2719_v48 }
 0x325   :  { %v2723_v50 = vpop.permute.xlu0 %2722 }
 0x326   :  { %v2725_v51 = vunpack.i.h.bf16 %v2723_v50  ;;  %v2724_v52 = vunpack.i.l.bf16 %v2723_v50  ;;  %2531 = vmatprep.subr.msk.bf16.mxu1 %vm2964_vm7, %v2529_v49 }
 0x327   :  { %2534 = vmatpush3.bf16.xpose.msk.msra.mxu1 %vm2964_vm7, %v2529_v49 }
 0x328   :  { %v2535_v53 = vpack.c.bf16 %v2725_v51, %v2724_v52 }
 0x329   :  { %v317_v54 = vpop.permute.xlu0 %316  ;;  %v2728_v55 = vpop.permute.xlu1 %2727 }
 0x32a   :  { %v2730_v56 = vunpack.i.h.bf16 %v2728_v55  ;;  %v2729_v57 = vunpack.i.l.bf16 %v2728_v55  ;;  %2537 = vmatprep.subr.msk.bf16.mxu1 %vm2964_vm7, %v2535_v53  ;;  %2293 = vmatprep.mubr.msk.f32.mxu1 %vm186_vm6, %v317_v54 }
 0x32c   :  { %v2541_v58 = vpack.c.bf16 %v2730_v56, %v2729_v57 }
 0x32d   :  { %v319_v59 = vpop.permute.xlu1 %318  ;;  %v321_v60 = vpop.permute.xlu0 %320 }
 0x32f   :  { %2540 = vmatpush3.bf16.xpose.msk.msra.mxu1 %vm2964_vm7, %v2535_v53 }
 0x330   :  { %2543 = vmatprep.subr.msk.bf16.mxu1 %vm2964_vm7, %v2541_v58 }
 0x331   :  { %v323_v61 = vpop.permute.xlu1 %322  ;;  %v325_v62 = vpop.permute.xlu0 %324 }
 0x335   :  { %v327_v63 = vpop.permute.xlu1 %326  ;;  %v329_v0 = vpop.permute.xlu0 %328 }
 0x337   :  { %2546 = vmatpush3.bf16.xpose.msk.msra.mxu1 %vm2964_vm7, %v2541_v58 }
 0x339   :  { %v331_v1 = vpop.permute.xlu1 %330 }
 0x33e   :  { %2294 = vmatmul.mubr.msk.f32.vlgmr.msra.gmra.mrb[8].mxu1 %vm186_vm6, %v319_v59 }
 0x33f   :  { %2296 = vmatprep.mubr.msk.f32.mxu1 %vm186_vm6, %v321_v60 }
 0x342   :  { %2297 = vmatmul.mubr.msk.f32.gmra.mrb[10].mxu1 %vm186_vm6, %v323_v61 }
 0x343   :  { %2299 = vmatprep.mubr.msk.f32.mxu1 %vm186_vm6, %v325_v62 }
 0x346   :  { %2300 = vmatmul.mubr.msk.f32.gmra.mrb[12].mxu1 %vm186_vm6, %v327_v63 }
 0x347   :  { %2302 = vmatprep.mubr.msk.f32.mxu1 %vm186_vm6, %v329_v0 }
 0x34a   :  { %2303 = vmatmul.mubr.msk.f32.gmra.mrb[14].mxu1 %vm186_vm6, %v331_v1 }
 0x411   :  { %v2295_v4 = vpop.f32.mrb[8].mxu1 }
 0x412   :  { %v452_v5 = vadd.f32 %v2295_v4, %v3006_v2  ;;  %v446_v7 = vpop.f32.mrb[9].mxu1 }
 0x413   :  { %v447_v8 = vadd.f32 %v446_v7, %v3011_v3 }
 0x414   :  { %v489_v9 = vsel %vm485_vm8, %v452_v5, -inf }
 0x415   :  { %490 = vmax.xlane.f32.xlu1 %v489_v9  ;;  %v2298_v11 = vpop.f32.mrb[10].mxu1  ;;  %v486_v12 = vsel %vm485_vm8, %v447_v8, -inf }
 0x416   :  { %v456_v14 = vpop.f32.mrb[11].mxu1  ;;  %487 = vmax.xlane.f32.xlu0 %v486_v12  ;;  %v462_v19 = vadd.f32 %v2298_v11, %v3025_v13 }
 0x417   :  { %v457_v15 = vadd.f32 %v456_v14, %v3019_v10 }
 0x418   :  { %v495_v29 = vsel %vm485_vm8, %v462_v19, -inf }
 0x419   :  { %v2301_v20 = vpop.f32.mrb[12].mxu1  ;;  %v492_v21 = vsel %vm485_vm8, %v457_v15, -inf }
 0x41a   :  { %v466_v23 = vpop.f32.mrb[13].mxu1  ;;  %493 = vmax.xlane.f32.xlu0 %v492_v21  ;;  %v472_v26 = vadd.f32 %v2301_v20, %v3038_v22 }
 0x41b   :  { %v467_v24 = vadd.f32 %v466_v23, %v3031_v16 }
 0x41c   :  { %v501_v35 = vsel %vm485_vm8, %v472_v26, -inf }
 0x41d   :  { %v2304_v27 = vpop.f32.mrb[14].mxu1  ;;  %v498_v28 = vsel %vm485_vm8, %v467_v24, -inf }
 0x41e   :  { %v476_v31 = vpop.f32.mrb[15].mxu1  ;;  %499 = vmax.xlane.f32.xlu1 %v498_v28  ;;  %496 = vmax.xlane.f32.xlu0 %v495_v29  ;;  %v482_v33 = vadd.f32 %v2304_v27, %v3052_v30 }
 0x41f   :  { %v477_v32 = vadd.f32 %v476_v31, %v3044_v25 }
 0x420   :  { %v507_v37 = vsel %vm485_vm8, %v482_v33, -inf }
 0x421   :  { %v504_v34 = vsel %vm485_vm8, %v477_v32, -inf }
 0x422   :  { %505 = vmax.xlane.f32.xlu1 %v504_v34  ;;  %502 = vmax.xlane.f32.xlu0 %v501_v35 }
 0x426   :  { %508 = vmax.xlane.f32.xlu0 %v507_v37 }
 0x4a2   :  { %v491_v38 = vpop.xlane.xlu1 %490 }
 0x4a3   :  { %v511_v39 = vsub.f32 %v452_v5, %v491_v38  ;;  %v488_v40 = vpop.xlane.xlu0 %487 }
 0x4a4   :  { %v510_v41 = vsub.f32 %v447_v8, %v488_v40 }
 0x4a5   :  { %v520_v42 = vmul.f32 1.442695, %v511_v39 }
 0x4a6   :  { %v518_v43 = vmul.f32 1.442695, %v510_v41 }
 0x4a7   :  { %2751 = vpow2.f32 %v520_v42  ;;  %v494_v44 = vpop.xlane.xlu0 %493 }
 0x4a8   :  { %2753 = vpow2.f32 %v518_v43  ;;  %v512_v45 = vsub.f32 %v457_v15, %v494_v44 }
 0x4aa   :  { %v522_v46 = vmul.f32 1.442695, %v512_v45 }
 0x4ab   :  { %v500_v47 = vpop.xlane.xlu1 %499  ;;  %v497_v48 = vpop.xlane.xlu0 %496 }
 0x4ac   :  { %2755 = vpow2.f32 %v522_v46  ;;  %v514_v49 = vsub.f32 %v467_v24, %v500_v47  ;;  %v513_v50 = vsub.f32 %v462_v19, %v497_v48 }
 0x4ae   :  { %v526_v51 = vmul.f32 1.442695, %v514_v49  ;;  %v524_v52 = vmul.f32 1.442695, %v513_v50  ;;  %v147_v50 = vld [vmem:[%s3465_s5] sm:$0xff] }
 0x4af   :  { %v506_v53 = vpop.xlane.xlu1 %505  ;;  %v503_v54 = vpop.xlane.xlu0 %502 }
 0x4b0   :  { %2757 = vpow2.f32 %v526_v51  ;;  %v516_v55 = vsub.f32 %v477_v32, %v506_v53  ;;  %v515_v56 = vsub.f32 %v472_v26, %v503_v54  ;;  %v148_v51 = vld [vmem:[%s3465_s5 + $0x8] sm:$0xff] }
 0x4b1   :  { %v2752_v57 = vpop.eup %2751  ;;  %2759 = vpow2.f32 %v524_v52  ;;  %v2563_v52 = vpack.c.bf16 %v148_v51, %v147_v50  ;;  %v156_v50 = vld [vmem:[%s3467_s7 + $0x8] sm:$0xff]  ;;  %v157_v51 = vld [vmem:[%s3467_s7 + $0x10] sm:$0xff] }
 0x4b2   :  { %v2754_v58 = vpop.eup %2753  ;;  %v530_v59 = vmul.f32 1.442695, %v516_v55  ;;  %v528_v60 = vmul.f32 1.442695, %v515_v56  ;;  %v537_v61 = vsel %vm485_vm8, %v2752_v57, 0.0  ;;  %v149_v55 = vld [vmem:[%s3465_s5 + $0x10] sm:$0xff] }
 0x4b3   :  { %538 = vadd.xlane.f32.xlu0 %v537_v61  ;;  %v509_v62 = vpop.xlane.xlu0 %508  ;;  %v534_v63 = vsel %vm485_vm8, %v2754_v58, 0.0  ;;  %2564 = vmatprep.subr.bf16.mxu0 %v2563_v52  ;;  %v150_v56 = vld [vmem:[%s3465_s5 + $0x18] sm:$0xff] }
 0x4b4   :  { %2761 = vpow2.f32 %v530_v59  ;;  %v517_v0 = vsub.f32 %v482_v33, %v509_v62  ;;  %535 = vadd.xlane.f32.xlu1 %v534_v63 }
 0x4b5   :  { %2763 = vpow2.f32 %v528_v60 }
 0x4b6   :  { %v2756_v1 = vpop.eup %2755  ;;  %v532_v4 = vmul.f32 1.442695, %v517_v0 }
 0x4b7   :  { %v540_v5 = vsel %vm485_vm8, %v2756_v1, 0.0 }
 0x4b8   :  { %2765 = vpow2.f32 %v532_v4  ;;  %541 = vadd.xlane.f32.xlu1 %v540_v5 }
 0x4ba   :  { %v2758_v7 = vpop.eup %2757 }
 0x4bb   :  { %v2760_v8 = vpop.eup %2759  ;;  %v546_v9 = vsel %vm485_vm8, %v2758_v7, 0.0 }
 0x4bc   :  { %547 = vadd.xlane.f32.xlu1 %v546_v9  ;;  %v543_v11 = vsel %vm485_vm8, %v2760_v8, 0.0 }
 0x4bd   :  { %544 = vadd.xlane.f32.xlu0 %v543_v11 }
 0x4be   :  { %v2762_v12 = vpop.eup %2761 }
 0x4bf   :  { %v2764_v14 = vpop.eup %2763  ;;  %v552_v15 = vsel %vm485_vm8, %v2762_v12, 0.0 }
 0x4c0   :  { %553 = vadd.xlane.f32.xlu1 %v552_v15  ;;  %v549_v19 = vsel %vm485_vm8, %v2764_v14, 0.0 }
 0x4c1   :  { %550 = vadd.xlane.f32.xlu0 %v549_v19 }
 0x4c2   :  { %v2766_v20 = vpop.eup %2765 }
 0x4c3   :  { %v555_v21 = vsel %vm485_vm8, %v2766_v20, 0.0 }
 0x4c5   :  { %556 = vadd.xlane.f32.xlu0 %v555_v21 }
 0x540   :  { %v539_v23 = vpop.xlane.xlu0 %538 }
 0x541   :  { %2767 = vrcp.f32 %v539_v23  ;;  %v536_v24 = vpop.xlane.xlu1 %535  ;;  %v3108_v23 = vld [vmem:[%s3468_s8] sm:$0xff] }
 0x542   :  { %2769 = vrcp.f32 %v536_v24 }
 0x545   :  { %v542_v26 = vpop.xlane.xlu1 %541 }
 0x546   :  { %2771 = vrcp.f32 %v542_v26 }
 0x549   :  { %v548_v27 = vpop.xlane.xlu1 %547 }
 0x54a   :  { %2773 = vrcp.f32 %v548_v27  ;;  %v545_v28 = vpop.xlane.xlu0 %544 }
 0x54b   :  { %v2768_v29 = vpop.eup %2767  ;;  %2775 = vrcp.f32 %v545_v28 }
 0x54c   :  { %v2770_v31 = vpop.eup %2769  ;;  %v567_v34 = vmul.f32 %v2768_v29, %v2752_v57  ;;  %v2567_v57 = vpack.c.bf16 %v150_v56, %v149_v55  ;;  %v159_v55 = vld [vmem:[%s3467_s7 + $0x20] sm:$0xff]  ;;  %v160_v56 = vld [vmem:[%s3467_s7 + $0x28] sm:$0xff] }
 0x54d   :  { %v554_v32 = vpop.xlane.xlu1 %553  ;;  %v566_v33 = vmul.f32 %v2770_v31, %v2754_v58 }
 0x54e   :  { %2777 = vrcp.f32 %v554_v32  ;;  %v551_v35 = vpop.xlane.xlu0 %550 }
 0x54f   :  { %2779 = vrcp.f32 %v551_v35  ;;  %2321 = vmatprep.mubr.msk.f32.mxu0 %vm485_vm8, %v566_v33 }
 0x550   :  { %v2772_v37 = vpop.eup %2771  ;;  %2322 = vmatmul.mubr.msk.f32.vlgmr.msra.gmra.mrb[2].mxu0 %vm485_vm8, %v567_v34 }
 0x551   :  { %v568_v38 = vmul.f32 %v2772_v37, %v2756_v1  ;;  %2566 = vmatpush3.bf16.msra.mxu0 %v2563_v52 }
 0x552   :  { %v557_v39 = vpop.xlane.xlu0 %556  ;;  %2568 = vmatprep.subr.bf16.mxu0 %v2567_v57 }
 0x553   :  { %2781 = vrcp.f32 %v557_v39  ;;  %2324 = vmatprep.mubr.msk.f32.mxu0 %vm485_vm8, %v568_v38 }
 0x554   :  { %v2774_v40 = vpop.eup %2773 }
 0x555   :  { %v2776_v41 = vpop.eup %2775  ;;  %v570_v42 = vmul.f32 %v2774_v40, %v2758_v7  ;;  %2570 = vmatpush3.bf16.msra.mxu0 %v2567_v57  ;;  %v2587_v57 = vpack.c.bf16 %v160_v56, %v159_v55 }
 0x556   :  { %v569_v43 = vmul.f32 %v2776_v41, %v2760_v8 }
 0x558   :  { %v2778_v44 = vpop.eup %2777  ;;  %2325 = vmatmul.mubr.msk.f32.gmra.mrb[4].mxu0 %vm485_vm8, %v569_v43  ;;  %v151_v43 = vld [vmem:[%s3466_s6] sm:$0xff] }
 0x559   :  { %v2780_v45 = vpop.eup %2779  ;;  %2327 = vmatprep.mubr.msk.f32.mxu0 %vm485_vm8, %v570_v42  ;;  %v572_v46 = vmul.f32 %v2778_v44, %v2762_v12  ;;  %v152_v44 = vld [vmem:[%s3466_s6 + $0x8] sm:$0xff] }
 0x55a   :  { %v571_v47 = vmul.f32 %v2780_v45, %v2764_v14  ;;  %v2571_v45 = vpack.c.bf16 %v152_v44, %v151_v43 }
 0x55c   :  { %2328 = vmatmul.mubr.msk.f32.gmra.mrb[6].mxu0 %vm485_vm8, %v571_v47  ;;  %2572 = vmatprep.subr.bf16.mxu0 %v2571_v45  ;;  %v154_v47 = vld [vmem:[%s3466_s6 + $0x18] sm:$0xff] }
 0x55d   :  { %v2782_v48 = vpop.eup %2781  ;;  %2330 = vmatprep.mubr.msk.f32.mxu0 %vm485_vm8, %v572_v46  ;;  %v153_v46 = vld [vmem:[%s3466_s6 + $0x10] sm:$0xff] }
 0x55e   :  { %v573_v49 = vmul.f32 %v2782_v48, %v2766_v20  ;;  %v3102_v20 = vshrl.u32 %v35_v6, 7  ;;  %v2575_v48 = vpack.c.bf16 %v154_v47, %v153_v46 }
 0x560   :  { %2331 = vmatmul.mubr.msk.f32.gmra.mrb[8].mxu0 %vm485_vm8, %v573_v49  ;;  %v737_v21 = vsub.s32 0, %v3102_v20  ;;  %v155_v49 = vld [vmem:[%s3467_s7] sm:$0xff]  ;;  %v951_v47 = vsub.s32 4, %v3102_v20 }
 0x561   :  { %v2579_v52 = vpack.c.bf16 %v156_v50, %v155_v49 }
 0x562   :  { %v738_v24 = vrot.slane %v3108_v23, %v737_v21 }
 0x563   :  { %2580 = vmatprep.subr.bf16.mxu1 %v2579_v52 }
 0x564   :  { %2582 = vmatpush3.bf16.msra.mxu1 %v2579_v52 }
 0x623   :  { %v2323_v53 = vpop.f32.mrb[2].mxu0 }
 0x624   :  { %v664_v54 = vpop.f32.mrb[3].mxu0 }
 0x62b   :  { %v2326_v58 = vpop.f32.mrb[4].mxu0 }
 0x62c   :  { %707 = vrot.lane.b32.xlu0 %v2326_v58, %s2861_s23  ;;  %v674_v59 = vpop.f32.mrb[5].mxu0  ;;  %v161_v58 = vld [vmem:[%s3467_s7 + $0x30] sm:$0xff] }
 0x62d   :  { %705 = vrot.lane.b32.xlu1 %v674_v59, %s2861_s23  ;;  %v162_v59 = vld [vmem:[%s3467_s7 + $0x38] sm:$0xff] }
 0x62f   :  { %v2329_v60 = vpop.f32.mrb[6].mxu0 }
 0x630   :  { %v684_v61 = vpop.f32.mrb[7].mxu0 }
 0x631   :  { %715 = vrot.lane.b32.xlu1 %v2329_v60, %s2862_s24  ;;  %v2591_v60 = vpack.c.bf16 %v162_v59, %v161_v58 }
 0x633   :  { %v2332_v62 = vpop.f32.mrb[8].mxu0 }
 0x634   :  { %v694_v63 = vpop.f32.mrb[9].mxu0 }
 0x635   :  { %713 = vrot.lane.b32.xlu1 %v684_v61, %s2862_s24  ;;  %721 = vrot.lane.b32.xlu0 %v694_v63, %s2863_s25  ;;  %v163_v61 = vld [vmem:[%s3467_s7 + $0x40] sm:$0xff] }
 0x639   :  { %723 = vrot.lane.b32.xlu1 %v2332_v62, %s2863_s25  ;;  %v164_v62 = vld [vmem:[%s3467_s7 + $0x48] sm:$0xff] }
 0x63a   :  { %v2595_v63 = vpack.c.bf16 %v164_v62, %v163_v61 }
 0x69e   :  { %v708_v1 = vpop.permute.xlu0 %707 }
 0x69f   :  { %v706_v0 = vpop.permute.xlu1 %705  ;;  %v728_v12 = vsel %vm186_vm6, %v2323_v53, %v708_v1  ;;  %v158_v53 = vld [vmem:[%s3467_s7 + $0x18] sm:$0xff] }
 0x6a0   :  { %v727_v5 = vsel %vm186_vm6, %v664_v54, %v706_v0  ;;  %v2583_v54 = vpack.c.bf16 %v158_v53, %v157_v51  ;;  %v165_v0 = vld [vmem:[%s3467_s7 + $0x50] sm:$0xff]  ;;  %v166_v1 = vld [vmem:[%s3467_s7 + $0x58] sm:$0xff] }
 0x6a2   :  { %2584 = vmatprep.subr.bf16.mxu1 %v2583_v54 }
 0x6a3   :  { %v716_v4 = vpop.permute.xlu1 %715  ;;  %2586 = vmatpush3.bf16.msra.mxu1 %v2583_v54 }
 0x6a4   :  { %v731_v14 = vsel %vm729_vm10, %v728_v12, %v716_v4  ;;  %2588 = vmatprep.subr.bf16.mxu1 %v2587_v57  ;;  %v2599_v4 = vpack.c.bf16 %v166_v1, %v165_v0 }
 0x6a7   :  { %v714_v7 = vpop.permute.xlu1 %713  ;;  %v722_v8 = vpop.permute.xlu0 %721  ;;  %2590 = vmatpush3.bf16.msra.mxu1 %v2587_v57 }
 0x6a8   :  { %v730_v9 = vsel %vm729_vm10, %v727_v5, %v714_v7  ;;  %2592 = vmatprep.subr.bf16.mxu1 %v2591_v60  ;;  %v167_v5 = vld [vmem:[%s3467_s7 + $0x60] sm:$0xff]  ;;  %v168_v7 = vld [vmem:[%s3467_s7 + $0x68] sm:$0xff] }
 0x6a9   :  { %v733_v11 = vsel %vm732_vm9, %v730_v9, %v722_v8  ;;  %v2603_v8 = vpack.c.bf16 %v168_v7, %v167_v5  ;;  %v2048_v5 = vld [vmem:[%s3464_s4 + $0x8] sm:$0xff] }
 0x6aa   :  { %2341 = vmatprep.mubr.msk.f32.mxu0 %vm739_vm11, %v733_v11 }
 0x6ab   :  { %v724_v15 = vpop.permute.xlu1 %723  ;;  %2594 = vmatpush3.bf16.msra.mxu1 %v2591_v60 }
 0x6ac   :  { %v734_v19 = vsel %vm732_vm9, %v731_v14, %v724_v15  ;;  %2596 = vmatprep.subr.bf16.mxu1 %v2595_v63 }
 0x6ad   :  { %2342 = vmatmul.mubr.msk.f32.vlgmr.msra.gmra.mrb[10].mxu0 %vm739_vm11, %v734_v19 }
 0x6ae   :  { %2574 = vmatpush3.bf16.msra.mxu0 %v2571_v45 }
 0x6af   :  { %2576 = vmatprep.subr.bf16.mxu0 %v2575_v48  ;;  %2598 = vmatpush3.bf16.msra.mxu1 %v2595_v63 }
 0x6b0   :  { %2600 = vmatprep.subr.bf16.mxu1 %v2599_v4 }
 0x6b2   :  { %2578 = vmatpush3.bf16.msra.mxu0 %v2575_v48  ;;  %v952_v48 = vrot.slane %v3108_v23, %v951_v47 }
 0x6b3   :  { %2602 = vmatpush3.bf16.msra.mxu1 %v2599_v4 }
 0x6b4   :  { %2604 = vmatprep.subr.bf16.mxu1 %v2603_v8 }
 0x6b7   :  { %2606 = vmatpush3.bf16.msra.mxu1 %v2603_v8 }
 0x780   :  { %v2343_v26 = vpop.f32.mrb[10].mxu0 }
 0x781   :  { %v818_v27 = vadd.f32 %v2343_v26, %v738_v24  ;;  %v812_v28 = vpop.f32.mrb[11].mxu0  ;;  %v858_v26 = vsub.s32 2, %v3102_v20 }
 0x782   :  { %v813_v29 = vadd.f32 %v812_v28, %v738_v24  ;;  %v852_v24 = vsub.s32 1, %v3102_v20 }
 0x783   :  { %v822_v31 = vadd.f32 %v818_v27, %v2937_v18 }
 0x784   :  { %v821_v6 = vadd.f32 %v813_v29, %v2935_v17  ;;  %v853_v27 = vrot.slane %v3108_v23, %v852_v24 }
 0x785   :  { %v826_v32 = vsel %vm739_vm11, %v822_v31, 0.0 }
 0x786   :  { %827 = vadd.xlane.f32.xlu1 %v826_v32  ;;  %v823_v33 = vsel %vm739_vm11, %v821_v6, 0.0 }
 0x787   :  { %824 = vadd.xlane.f32.xlu0 %v823_v33 }
 0x813   :  { %v828_v34 = vpop.xlane.xlu1 %827 }
 0x814   :  { %v831_v35 = vmul.f32 0.03125, %v828_v34  ;;  %v825_v37 = vpop.xlane.xlu0 %824 }
 0x815   :  { %v830_v38 = vmul.f32 0.03125, %v825_v37 }
 0x816   :  { %v3117_v39 = vsub.f32 %v822_v31, %v831_v35  ;;  %v859_v31 = vrot.slane %v3108_v23, %v858_v26 }
 0x817   :  { %v3119_v40 = vsub.f32 %v821_v6, %v830_v38  ;;  %v169_v38 = vld [vmem:[%s3467_s7 + $0x70] sm:$0xff] }
 0x818   :  { %v835_v17 = vmul.f32 %v3117_v39, %v3117_v39 }
 0x819   :  { %v834_v41 = vmul.f32 %v3119_v40, %v3119_v40 }
 0x81a   :  { %v839_v42 = vsel %vm739_vm11, %v835_v17, 0.0 }
 0x81b   :  { %v836_v18 = vsel %vm739_vm11, %v834_v41, 0.0 }
 0x81c   :  { %837 = vadd.xlane.f32.xlu0 %v836_v18 }
 0x820   :  { %840 = vadd.xlane.f32.xlu0 %v839_v42 }
 0x8a9   :  { %v838_v9 = vpop.xlane.xlu0 %837 }
 0x8aa   :  { %v842_v11 = vmul.f32 0.03125, %v838_v9 }
 0x8ac   :  { %v844_v12 = vadd.f32 1e-05, %v842_v11 }
 0x8ad   :  { %v841_v14 = vpop.xlane.xlu0 %840 }
 0x8ae   :  { %2783 = vrsqrt.f32 %v844_v12  ;;  %v843_v15 = vmul.f32 0.03125, %v841_v14 }
 0x8b0   :  { %v845_v19 = vadd.f32 1e-05, %v843_v15  ;;  %v1058_v15 = vsub.s32 5, %v3102_v20 }
 0x8b2   :  { %2785 = vrsqrt.f32 %v845_v19  ;;  %v1064_v19 = vsub.s32 6, %v3102_v20 }
 0x8b8   :  { %v2784_v28 = vpop.eup %2783 }
 0x8b9   :  { %v848_v29 = vmul.f32 %v2784_v28, %v3119_v40  ;;  %v170_v40 = vld [vmem:[%s3467_s7 + $0x78] sm:$0xff] }
 0x8ba   :  { %v2607_v41 = vpack.c.bf16 %v170_v40, %v169_v38 }
 0x8bb   :  { %v854_v6 = vmul.f32 %v853_v27, %v848_v29 }
 0x8bc   :  { %v2786_v32 = vpop.eup %2785  ;;  %2608 = vmatprep.subr.bf16.mxu1 %v2607_v41 }
 0x8bd   :  { %v849_v33 = vmul.f32 %v2786_v32, %v3117_v39  ;;  %v860_v34 = vadd.f32 %v859_v31, %v854_v6  ;;  %2610 = vmatpush3.bf16.msra.mxu1 %v2607_v41  ;;  %v864_v39 = vsub.s32 3, %v3102_v20  ;;  %v1065_v6 = vrot.slane %v3108_v23, %v1064_v19 }
 0x8be   :  { %2390 = vmatprep.subr.mxu1 %v2048_v5 }
 0x8bf   :  { %v855_v35 = vmul.f32 %v853_v27, %v849_v33  ;;  %2352 = vmatprep.mubr.msk.f32.mxu0 %vm739_vm11, %v860_v34  ;;  %v865_v18 = vrot.slane %v3108_v23, %v864_v39  ;;  %v1059_v27 = vrot.slane %v3108_v23, %v1058_v15 }
 0x8c1   :  { %v861_v37 = vadd.f32 %v859_v31, %v855_v35 }
 0x8c3   :  { %2353 = vmatmul.mubr.msk.f32.vlgmr.msra.gmra.mrb[12].mxu0 %vm739_vm11, %v861_v37 }
 0x996   :  { %v2354_v17 = vpop.f32.mrb[12].mxu0 }
 0x997   :  { %v944_v42 = vadd.f32 %v2354_v17, %v865_v18  ;;  %v938_v43 = vpop.f32.mrb[13].mxu0 }
 0x998   :  { %v939_v44 = vadd.f32 %v938_v43, %v865_v18 }
 0x999   :  { %v948_v46 = vmax.f32 %v944_v42, 0.0 }
 0x99a   :  { %v947_v45 = vmax.f32 %v939_v44, 0.0 }
 0x99c   :  { %2387 = vmatprep.mubr.f32.mxu1 %v947_v45 }
 0x99d   :  { %2388 = vmatmul.mubr.f32.vlgmr.msra.gmra.mrb[16].mxu1 %v948_v46 }
 0x99e   :  { %2391 = vmatpush3.msra.mxu1 %v2048_v5 }
 0xa70   :  { %v2389_v49 = vpop.f32.mrb[16].mxu1 }
 0xa71   :  { %v1025_v50 = vadd.f32 %v2389_v49, %v952_v48  ;;  %v1019_v51 = vpop.f32.mrb[17].mxu1 }
 0xa72   :  { %v1020_v52 = vadd.f32 %v1019_v51, %v952_v48 }
 0xa73   :  { %v1029_v53 = vadd.f32 %v1025_v50, %v861_v37 }
 0xa74   :  { %v1028_v54 = vadd.f32 %v1020_v52, %v860_v34 }
 0xa75   :  { %v1033_v55 = vsel %vm739_vm11, %v1029_v53, 0.0 }
 0xa76   :  { %1034 = vadd.xlane.f32.xlu0 %v1033_v55  ;;  %v1030_v56 = vsel %vm739_vm11, %v1028_v54, 0.0 }
 0xa77   :  { %1031 = vadd.xlane.f32.xlu1 %v1030_v56 }
 0xb03   :  { %v1035_v57 = vpop.xlane.xlu0 %1034 }
 0xb04   :  { %v1037_v58 = vmul.f32 0.03125, %v1035_v57  ;;  %v1032_v59 = vpop.xlane.xlu1 %1031 }
 0xb05   :  { %v1036_v60 = vmul.f32 0.03125, %v1032_v59 }
 0xb06   :  { %v1039_v61 = vsub.f32 %v1029_v53, %v1037_v58 }
 0xb07   :  { %v1038_v62 = vsub.f32 %v1028_v54, %v1036_v60 }
 0xb08   :  { %v1041_v63 = vmul.f32 %v1039_v61, %v1039_v61 }
 0xb09   :  { %v1040_v0 = vmul.f32 %v1038_v62, %v1038_v62 }
 0xb0a   :  { %v1045_v1 = vsel %vm739_vm11, %v1041_v63, 0.0 }
 0xb0b   :  { %1046 = vadd.xlane.f32.xlu0 %v1045_v1  ;;  %v1042_v4 = vsel %vm739_vm11, %v1040_v0, 0.0 }
 0xb0c   :  { %1043 = vadd.xlane.f32.xlu1 %v1042_v4 }
 0xb98   :  { %v1047_v7 = vpop.xlane.xlu0 %1046 }
 0xb99   :  { %v1049_v8 = vmul.f32 0.03125, %v1047_v7  ;;  %v1044_v9 = vpop.xlane.xlu1 %1043 }
 0xb9a   :  { %v1048_v11 = vmul.f32 0.03125, %v1044_v9 }
 0xb9b   :  { %v1051_v12 = vadd.f32 1e-05, %v1049_v8 }
 0xb9c   :  { %v1050_v14 = vadd.f32 1e-05, %v1048_v11 }
 0xb9d   :  { %2787 = vrsqrt.f32 %v1051_v12 }
 0xb9e   :  { %2789 = vrsqrt.f32 %v1050_v14 }
 0xba7   :  { %v2788_v28 = vpop.eup %2787 }
 0xba8   :  { %v2790_v29 = vpop.eup %2789  ;;  %v1055_v31 = vmul.f32 %v2788_v28, %v1039_v61 }
 0xba9   :  { %v1054_v32 = vmul.f32 %v2790_v29, %v1038_v62 }
 0xbaa   :  { %v1061_v33 = vmul.f32 %v1059_v27, %v1055_v31 }
 0xbab   :  { %v1060_v34 = vmul.f32 %v1059_v27, %v1054_v32 }
 0xbac   :  { %v3222_v35 = vadd.f32 %v1065_v6, %v1061_v33 }
 0xbad   :  { %v3224_v37 = vadd.f32 %v1065_v6, %v1060_v34 }
 0xbae   :  { %1103 = vrot.lane.b32.xlu0 %v3222_v35, %s2859_s20 }
 0xbaf   :  { %1101 = vrot.lane.b32.xlu1 %v3224_v37, %s2859_s20  ;;  %2392 = vmatprep.mubr.msk.f32.mxu1 %vm186_vm6, %v3224_v37 }
 0xbb0   :  { %2393 = vmatmul.mubr.msk.f32.vlgmr.msra.gmra.mrb[18].mxu1 %vm186_vm6, %v3222_v35 }
 0xbb2   :  { %1109 = vrot.lane.b32.xlu0 %v3224_v37, %s2860_s2 }
 0xbb3   :  { %1105 = vrot.lane.b32.xlu1 %v3224_v37, %s2858_s19 }
 0xbb7   :  { %1107 = vrot.lane.b32.xlu1 %v3222_v35, %s2858_s19 }
 0xbbb   :  { %1111 = vrot.lane.b32.xlu1 %v3222_v35, %s2860_s2 }
 0xc20   :  { %v1104_v38 = vpop.permute.xlu0 %1103 }
 0xc21   :  { %v1102_v23 = vpop.permute.xlu1 %1101 }
 0xc22   :  { %2395 = vmatprep.mubr.msk.f32.mxu1 %vm186_vm6, %v1102_v23 }
 0xc23   :  { %2396 = vmatmul.mubr.msk.f32.gmra.mrb[20].mxu1 %vm186_vm6, %v1104_v38 }
 0xc24   :  { %v1110_v18 = vpop.permute.xlu0 %1109 }
 0xc25   :  { %v1106_v40 = vpop.permute.xlu1 %1105 }
 0xc26   :  { %2398 = vmatprep.mubr.msk.f32.mxu1 %vm186_vm6, %v1106_v40 }
 0xc29   :  { %v1108_v41 = vpop.permute.xlu1 %1107 }
 0xc2a   :  { %2399 = vmatmul.mubr.msk.f32.gmra.mrb[22].mxu1 %vm186_vm6, %v1108_v41 }
 0xc2b   :  { %2401 = vmatprep.mubr.msk.f32.mxu1 %vm186_vm6, %v1110_v18 }
 0xc2d   :  { %v1112_v17 = vpop.permute.xlu1 %1111 }
 0xc2e   :  { %2402 = vmatmul.mubr.msk.f32.gmra.mrb[24].mxu1 %vm186_vm6, %v1112_v17 }
 0xc83   :  { %v2394_v42 = vpop.f32.mrb[18].mxu1 }
 0xc84   :  { %v1195_v43 = vpop.f32.mrb[19].mxu1 }
 0xc85   :  { %v2731_v44 = vpack.i.bf16 %v2394_v42, %v1195_v43  ;;  %v2635_v45 = vpack.c.bf16 %v2394_v42, %v1195_v43 }
 0xc87   :  { %2732 = vrot.lane.b32.xlu0 %v2731_v44, %s2859_s20  ;;  %2636 = vmatprep.subr.bf16.mxu1 %v2635_v45 }
 0xc88   :  { %2638 = vmatpush3.bf16.msra.mxu1 %v2635_v45 }
 0xcf6   :  { %v2397_v46 = vpop.f32.mrb[20].mxu1 }
 0xcf7   :  { %v1205_v48 = vpop.f32.mrb[21].mxu1 }
 0xcf8   :  { %v2736_v49 = vpack.i.bf16 %v2397_v46, %v1205_v48  ;;  %v2639_v50 = vpack.c.bf16 %v2397_v46, %v1205_v48 }
 0xcf9   :  { %v2733_v51 = vpop.permute.xlu0 %2732 }
 0xcfa   :  { %v2735_v52 = vunpack.i.h.bf16 %v2733_v51  ;;  %v2734_v53 = vunpack.i.l.bf16 %v2733_v51  ;;  %2737 = vrot.lane.b32.xlu1 %v2736_v49, %s2859_s20  ;;  %2640 = vmatprep.subr.bf16.mxu1 %v2639_v50 }
 0xcfb   :  { %2642 = vmatpush3.bf16.msra.mxu1 %v2639_v50 }
 0xcfc   :  { %v2611_v54 = vpack.c.bf16 %v2735_v52, %v2734_v53 }
 0xcfd   :  { %v2400_v55 = vpop.f32.mrb[22].mxu1 }
 0xcfe   :  { %v1215_v56 = vpop.f32.mrb[23].mxu1  ;;  %2613 = vmatprep.subr.msk.bf16.mxu0 %vm2964_vm7, %v2611_v54 }
 0xcff   :  { %v2741_v57 = vpack.i.bf16 %v2400_v55, %v1215_v56  ;;  %v2643_v58 = vpack.c.bf16 %v2400_v55, %v1215_v56  ;;  %2616 = vmatpush3.bf16.xpose.msk.msra.mxu0 %vm2964_vm7, %v2611_v54 }
 0xd01   :  { %2742 = vrot.lane.b32.xlu0 %v2741_v57, %s2859_s20  ;;  %v2403_v59 = vpop.f32.mrb[24].mxu1  ;;  %2644 = vmatprep.subr.bf16.mxu1 %v2643_v58 }
 0xd02   :  { %v1225_v60 = vpop.f32.mrb[25].mxu1  ;;  %2646 = vmatpush3.bf16.msra.mxu1 %v2643_v58 }
 0xd03   :  { %v2746_v61 = vpack.i.bf16 %v2403_v59, %v1225_v60  ;;  %v2647_v62 = vpack.c.bf16 %v2403_v59, %v1225_v60 }
 0xd05   :  { %1242 = vrot.lane.b32.xlu0 %v1195_v43, %s2858_s19  ;;  %2747 = vrot.lane.b32.xlu1 %v2746_v61, %s2859_s20 }
 0xd06   :  { %2648 = vmatprep.subr.bf16.mxu1 %v2647_v62 }
 0xd07   :  { %2650 = vmatpush3.bf16.msra.mxu1 %v2647_v62 }
 0xd09   :  { %1246 = vrot.lane.b32.xlu0 %v1205_v48, %s2858_s19  ;;  %1244 = vrot.lane.b32.xlu1 %v2394_v42, %s2858_s19 }
 0xd0d   :  { %1250 = vrot.lane.b32.xlu0 %v1215_v56, %s2858_s19  ;;  %1248 = vrot.lane.b32.xlu1 %v2397_v46, %s2858_s19 }
 0xd11   :  { %1254 = vrot.lane.b32.xlu0 %v1225_v60, %s2858_s19  ;;  %1252 = vrot.lane.b32.xlu1 %v2400_v55, %s2858_s19 }
 0xd15   :  { %1256 = vrot.lane.b32.xlu1 %v2403_v59, %s2858_s19 }
 0xd6c   :  { %v2738_v63 = vpop.permute.xlu1 %2737 }
 0xd6d   :  { %v2740_v0 = vunpack.i.h.bf16 %v2738_v63  ;;  %v2739_v1 = vunpack.i.l.bf16 %v2738_v63 }
 0xd6f   :  { %v2617_v4 = vpack.c.bf16 %v2740_v0, %v2739_v1 }
 0xd71   :  { %2619 = vmatprep.subr.msk.bf16.mxu0 %vm2964_vm7, %v2617_v4 }
 0xd72   :  { %2622 = vmatpush3.bf16.xpose.msk.msra.mxu0 %vm2964_vm7, %v2617_v4 }
 0xd73   :  { %v2743_v5 = vpop.permute.xlu0 %2742 }
 0xd74   :  { %v2745_v7 = vunpack.i.h.bf16 %v2743_v5  ;;  %v2744_v8 = vunpack.i.l.bf16 %v2743_v5 }
 0xd76   :  { %v2623_v9 = vpack.c.bf16 %v2745_v7, %v2744_v8 }
 0xd77   :  { %v1243_v11 = vpop.permute.xlu0 %1242  ;;  %v2748_v12 = vpop.permute.xlu1 %2747 }
 0xd78   :  { %v2750_v14 = vunpack.i.h.bf16 %v2748_v12  ;;  %v2749_v27 = vunpack.i.l.bf16 %v2748_v12  ;;  %2625 = vmatprep.subr.msk.bf16.mxu0 %vm2964_vm7, %v2623_v9  ;;  %2420 = vmatprep.mubr.msk.f32.mxu0 %vm186_vm6, %v1243_v11 }
 0xd7a   :  { %v2629_v28 = vpack.c.bf16 %v2750_v14, %v2749_v27  ;;  %2628 = vmatpush3.bf16.xpose.msk.msra.mxu0 %vm2964_vm7, %v2623_v9 }
 0xd7b   :  { %v1245_v29 = vpop.permute.xlu1 %1244  ;;  %v1247_v31 = vpop.permute.xlu0 %1246 }
 0xd7c   :  { %2631 = vmatprep.subr.msk.bf16.mxu0 %vm2964_vm7, %v2629_v28 }
 0xd7f   :  { %v1249_v6 = vpop.permute.xlu1 %1248  ;;  %v1251_v32 = vpop.permute.xlu0 %1250 }
 0xd82   :  { %2634 = vmatpush3.bf16.xpose.msk.msra.mxu0 %vm2964_vm7, %v2629_v28 }
 0xd83   :  { %v1253_v33 = vpop.permute.xlu1 %1252  ;;  %v1255_v34 = vpop.permute.xlu0 %1254 }
 0xd87   :  { %v1257_v23 = vpop.permute.xlu1 %1256 }
 0xd89   :  { %2421 = vmatmul.mubr.msk.f32.vlgmr.msra.gmra.mrb[14].mxu0 %vm186_vm6, %v1245_v29 }
 0xd8a   :  { %2423 = vmatprep.mubr.msk.f32.mxu0 %vm186_vm6, %v1247_v31 }
 0xd8d   :  { %2424 = vmatmul.mubr.msk.f32.gmra.mrb[16].mxu0 %vm186_vm6, %v1249_v6 }
 0xd8e   :  { %2426 = vmatprep.mubr.msk.f32.mxu0 %vm186_vm6, %v1251_v32 }
 0xd91   :  { %2427 = vmatmul.mubr.msk.f32.gmra.mrb[18].mxu0 %vm186_vm6, %v1253_v33 }
 0xd92   :  { %2429 = vmatprep.mubr.msk.f32.mxu0 %vm186_vm6, %v1255_v34 }
 0xd95   :  { %2430 = vmatmul.mubr.msk.f32.gmra.mrb[20].mxu0 %vm186_vm6, %v1257_v23 }
 0xe5c   :  { %v2422_v36 = vpop.f32.mrb[14].mxu0 }
 0xe5d   :  { %v1378_v38 = vadd.f32 %v2422_v36, %v3006_v2  ;;  %v1372_v40 = vpop.f32.mrb[15].mxu0 }
 0xe5e   :  { %v1373_v41 = vadd.f32 %v1372_v40, %v3011_v3 }
 0xe5f   :  { %v1414_v18 = vsel %vm485_vm8, %v1378_v38, -inf }
 0xe60   :  { %1415 = vmax.xlane.f32.xlu1 %v1414_v18  ;;  %v2425_v17 = vpop.f32.mrb[16].mxu0  ;;  %v1411_v42 = vsel %vm485_vm8, %v1373_v41, -inf }
 0xe61   :  { %v1382_v43 = vpop.f32.mrb[17].mxu0  ;;  %1412 = vmax.xlane.f32.xlu0 %v1411_v42  ;;  %v1388_v45 = vadd.f32 %v2425_v17, %v3025_v13 }
 0xe62   :  { %v1383_v44 = vadd.f32 %v1382_v43, %v3019_v10 }
 0xe63   :  { %v1420_v52 = vsel %vm485_vm8, %v1388_v45, -inf }
 0xe64   :  { %v2428_v46 = vpop.f32.mrb[18].mxu0  ;;  %v1417_v48 = vsel %vm485_vm8, %v1383_v44, -inf }
 0xe65   :  { %v1392_v49 = vpop.f32.mrb[19].mxu0  ;;  %1418 = vmax.xlane.f32.xlu0 %v1417_v48  ;;  %v1398_v3 = vadd.f32 %v2428_v46, %v3038_v22 }
 0xe66   :  { %v1393_v2 = vadd.f32 %v1392_v49, %v3031_v16 }
 0xe67   :  { %v1426_v55 = vsel %vm485_vm8, %v1398_v3, -inf }
 0xe68   :  { %v2431_v50 = vpop.f32.mrb[20].mxu0  ;;  %v1423_v51 = vsel %vm485_vm8, %v1393_v2, -inf }
 0xe69   :  { %v1402_v53 = vpop.f32.mrb[21].mxu0  ;;  %1424 = vmax.xlane.f32.xlu1 %v1423_v51  ;;  %1421 = vmax.xlane.f32.xlu0 %v1420_v52  ;;  %v1408_v13 = vadd.f32 %v2431_v50, %v3052_v30 }
 0xe6a   :  { %v1403_v10 = vadd.f32 %v1402_v53, %v3044_v25 }
 0xe6b   :  { %v1432_v16 = vsel %vm485_vm8, %v1408_v13, -inf }
 0xe6c   :  { %v1429_v54 = vsel %vm485_vm8, %v1403_v10, -inf }
 0xe6d   :  { %1430 = vmax.xlane.f32.xlu1 %v1429_v54  ;;  %1427 = vmax.xlane.f32.xlu0 %v1426_v55 }
 0xe71   :  { %1433 = vmax.xlane.f32.xlu0 %v1432_v16 }
 0xeed   :  { %v1416_v22 = vpop.xlane.xlu1 %1415 }
 0xeee   :  { %v1436_v56 = vsub.f32 %v1378_v38, %v1416_v22  ;;  %v1413_v57 = vpop.xlane.xlu0 %1412 }
 0xeef   :  { %v1435_v58 = vsub.f32 %v1373_v41, %v1413_v57 }
 0xef0   :  { %v1445_v59 = vmul.f32 1.442695, %v1436_v56 }
 0xef1   :  { %v1443_v60 = vmul.f32 1.442695, %v1435_v58 }
 0xef2   :  { %2791 = vpow2.f32 %v1445_v59  ;;  %v1419_v61 = vpop.xlane.xlu0 %1418 }
 0xef3   :  { %2793 = vpow2.f32 %v1443_v60  ;;  %v1437_v25 = vsub.f32 %v1383_v44, %v1419_v61 }
 0xef5   :  { %v1447_v30 = vmul.f32 1.442695, %v1437_v25 }
 0xef6   :  { %v1425_v62 = vpop.xlane.xlu1 %1424  ;;  %v1422_v63 = vpop.xlane.xlu0 %1421 }
 0xef7   :  { %2795 = vpow2.f32 %v1447_v30  ;;  %v1439_v0 = vsub.f32 %v1393_v2, %v1425_v62  ;;  %v1438_v1 = vsub.f32 %v1388_v45, %v1422_v63  ;;  %v2049_v63 = vld [vmem:[%s3465_s5 + $0x20] sm:$0xff] }
 0xef9   :  { %v1451_v4 = vmul.f32 1.442695, %v1439_v0  ;;  %v1449_v5 = vmul.f32 1.442695, %v1438_v1  ;;  %v2050_v0 = vld [vmem:[%s3465_s5 + $0x28] sm:$0xff] }
 0xefa   :  { %v1431_v7 = vpop.xlane.xlu1 %1430  ;;  %v1428_v8 = vpop.xlane.xlu0 %1427  ;;  %v2651_v1 = vpack.c.bf16 %v2050_v0, %v2049_v63  ;;  %v2061_v0 = vld [vmem:[%s3467_s7 + $0xa0] sm:$0xff] }
 0xefb   :  { %2797 = vpow2.f32 %v1451_v4  ;;  %v1441_v9 = vsub.f32 %v1403_v10, %v1431_v7  ;;  %v1440_v11 = vsub.f32 %v1398_v3, %v1428_v8  ;;  %v2051_v7 = vld [vmem:[%s3465_s5 + $0x30] sm:$0xff]  ;;  %v2052_v8 = vld [vmem:[%s3465_s5 + $0x38] sm:$0xff] }
 0xefc   :  { %v2792_v12 = vpop.eup %2791  ;;  %2799 = vpow2.f32 %v1449_v5  ;;  %2652 = vmatprep.subr.bf16.mxu1 %v2651_v1 }
 0xefd   :  { %v2794_v14 = vpop.eup %2793  ;;  %v1455_v27 = vmul.f32 1.442695, %v1441_v9  ;;  %v1453_v28 = vmul.f32 1.442695, %v1440_v11  ;;  %v1462_v29 = vsel %vm485_vm8, %v2792_v12, 0.0  ;;  %v2655_v9 = vpack.c.bf16 %v2052_v8, %v2051_v7  ;;  %v2064_v7 = vld [vmem:[%s3467_s7 + $0xb8] sm:$0xff] }
 0xefe   :  { %1463 = vadd.xlane.f32.xlu0 %v1462_v29  ;;  %v1434_v31 = vpop.xlane.xlu0 %1433  ;;  %v1459_v6 = vsel %vm485_vm8, %v2794_v14, 0.0 }
 0xeff   :  { %2801 = vpow2.f32 %v1455_v27  ;;  %v1442_v32 = vsub.f32 %v1408_v13, %v1434_v31  ;;  %1460 = vadd.xlane.f32.xlu1 %v1459_v6 }
 0xf00   :  { %2803 = vpow2.f32 %v1453_v28 }
 0xf01   :  { %v2796_v33 = vpop.eup %2795  ;;  %v1457_v34 = vmul.f32 1.442695, %v1442_v32 }
 0xf02   :  { %v1465_v23 = vsel %vm485_vm8, %v2796_v33, 0.0 }
 0xf03   :  { %2805 = vpow2.f32 %v1457_v34  ;;  %1466 = vadd.xlane.f32.xlu1 %v1465_v23 }
 0xf05   :  { %v2798_v36 = vpop.eup %2797 }
 0xf06   :  { %v2800_v38 = vpop.eup %2799  ;;  %v1471_v40 = vsel %vm485_vm8, %v2798_v36, 0.0 }
 0xf07   :  { %1472 = vadd.xlane.f32.xlu1 %v1471_v40  ;;  %v1468_v41 = vsel %vm485_vm8, %v2800_v38, 0.0 }
 0xf08   :  { %1469 = vadd.xlane.f32.xlu0 %v1468_v41 }
 0xf09   :  { %v2802_v18 = vpop.eup %2801 }
 0xf0a   :  { %v2804_v17 = vpop.eup %2803  ;;  %v1477_v42 = vsel %vm485_vm8, %v2802_v18, 0.0 }
 0xf0b   :  { %1478 = vadd.xlane.f32.xlu1 %v1477_v42  ;;  %v1474_v43 = vsel %vm485_vm8, %v2804_v17, 0.0  ;;  %v3345_v42 = vld [vmem:[%s3468_s8 + $0x8] sm:$0xff] }
 0xf0c   :  { %1475 = vadd.xlane.f32.xlu0 %v1474_v43  ;;  %v1661_v43 = vrot.slane %v3345_v42, %v737_v21 }
 0xf0d   :  { %v2806_v44 = vpop.eup %2805 }
 0xf0e   :  { %v1480_v45 = vsel %vm485_vm8, %v2806_v44, 0.0 }
 0xf10   :  { %1481 = vadd.xlane.f32.xlu0 %v1480_v45 }
 0xf8b   :  { %v1464_v46 = vpop.xlane.xlu0 %1463 }
 0xf8c   :  { %2807 = vrcp.f32 %v1464_v46  ;;  %v1461_v48 = vpop.xlane.xlu1 %1460 }
 0xf8d   :  { %2809 = vrcp.f32 %v1461_v48 }
 0xf90   :  { %v1467_v49 = vpop.xlane.xlu1 %1466 }
 0xf91   :  { %2811 = vrcp.f32 %v1467_v49 }
 0xf94   :  { %v1473_v2 = vpop.xlane.xlu1 %1472 }
 0xf95   :  { %2813 = vrcp.f32 %v1473_v2  ;;  %v1470_v3 = vpop.xlane.xlu0 %1469 }
 0xf96   :  { %v2808_v50 = vpop.eup %2807  ;;  %2815 = vrcp.f32 %v1470_v3 }
 0xf97   :  { %v2810_v51 = vpop.eup %2809  ;;  %v1492_v10 = vmul.f32 %v2808_v50, %v2792_v12 }
 0xf98   :  { %v1479_v52 = vpop.xlane.xlu1 %1478  ;;  %v1491_v53 = vmul.f32 %v2810_v51, %v2794_v14 }
 0xf99   :  { %2817 = vrcp.f32 %v1479_v52  ;;  %v1476_v13 = vpop.xlane.xlu0 %1475 }
 0xf9a   :  { %2819 = vrcp.f32 %v1476_v13  ;;  %2448 = vmatprep.mubr.msk.f32.mxu1 %vm485_vm8, %v1491_v53 }
 0xf9b   :  { %v2812_v54 = vpop.eup %2811  ;;  %2449 = vmatmul.mubr.msk.f32.vlgmr.msra.gmra.mrb[26].mxu1 %vm485_vm8, %v1492_v10 }
 0xf9c   :  { %v1493_v55 = vmul.f32 %v2812_v54, %v2796_v33  ;;  %2654 = vmatpush3.bf16.msra.mxu1 %v2651_v1  ;;  %v2062_v1 = vld [vmem:[%s3467_s7 + $0xa8] sm:$0xff] }
 0xf9d   :  { %v1482_v16 = vpop.xlane.xlu0 %1481  ;;  %2656 = vmatprep.subr.bf16.mxu1 %v2655_v9 }
 0xf9e   :  { %2821 = vrcp.f32 %v1482_v16  ;;  %2451 = vmatprep.mubr.msk.f32.mxu1 %vm485_vm8, %v1493_v55  ;;  %v2053_v16 = vld [vmem:[%s3466_s6 + $0x20] sm:$0xff] }
 0xf9f   :  { %v2814_v22 = vpop.eup %2813 }
 0xfa0   :  { %v2816_v56 = vpop.eup %2815  ;;  %v1495_v57 = vmul.f32 %v2814_v22, %v2798_v36  ;;  %2658 = vmatpush3.bf16.msra.mxu1 %v2655_v9  ;;  %v2054_v22 = vld [vmem:[%s3466_s6 + $0x28] sm:$0xff]  ;;  %v2065_v9 = vld [vmem:[%s3467_s7 + $0xc0] sm:$0xff] }
 0xfa1   :  { %v1494_v58 = vmul.f32 %v2816_v56, %v2800_v38  ;;  %v2659_v56 = vpack.c.bf16 %v2054_v22, %v2053_v16 }
 0xfa3   :  { %v2818_v59 = vpop.eup %2817  ;;  %2452 = vmatmul.mubr.msk.f32.gmra.mrb[28].mxu1 %vm485_vm8, %v1494_v58  ;;  %2660 = vmatprep.subr.bf16.mxu1 %v2659_v56  ;;  %v2056_v58 = vld [vmem:[%s3466_s6 + $0x38] sm:$0xff] }
 0xfa4   :  { %v2820_v60 = vpop.eup %2819  ;;  %2454 = vmatprep.mubr.msk.f32.mxu1 %vm485_vm8, %v1495_v57  ;;  %v1497_v61 = vmul.f32 %v2818_v59, %v2802_v18  ;;  %v2055_v57 = vld [vmem:[%s3466_s6 + $0x30] sm:$0xff] }
 0xfa5   :  { %v1496_v25 = vmul.f32 %v2820_v60, %v2804_v17  ;;  %v2663_v59 = vpack.c.bf16 %v2056_v58, %v2055_v57  ;;  %v2057_v60 = vld [vmem:[%s3467_s7 + $0x80] sm:$0xff] }
 0xfa7   :  { %2455 = vmatmul.mubr.msk.f32.gmra.mrb[30].mxu1 %vm485_vm8, %v1496_v25  ;;  %v2059_v25 = vld [vmem:[%s3467_s7 + $0x90] sm:$0xff] }
 0xfa8   :  { %v2822_v30 = vpop.eup %2821  ;;  %2457 = vmatprep.mubr.msk.f32.mxu1 %vm485_vm8, %v1497_v61  ;;  %v2058_v61 = vld [vmem:[%s3467_s7 + $0x88] sm:$0xff] }
 0xfa9   :  { %v1498_v62 = vmul.f32 %v2822_v30, %v2806_v44  ;;  %v2667_v30 = vpack.c.bf16 %v2058_v61, %v2057_v60 }
 0xfab   :  { %2458 = vmatmul.mubr.msk.f32.gmra.mrb[32].mxu1 %vm485_vm8, %v1498_v62  ;;  %v2060_v62 = vld [vmem:[%s3467_s7 + $0x98] sm:$0xff]  ;;  %2668 = vmatprep.subr.bf16.mxu0 %v2667_v30 }
 0xfac   :  { %v2671_v63 = vpack.c.bf16 %v2060_v62, %v2059_v25  ;;  %2670 = vmatpush3.bf16.msra.mxu0 %v2667_v30 }
 0xfae   :  { %2672 = vmatprep.subr.bf16.mxu0 %v2671_v63 }
 0xfb0   :  { %2674 = vmatpush3.bf16.msra.mxu0 %v2671_v63 }
0x106e   :  { %v2450_v4 = vpop.f32.mrb[26].mxu1 }
0x106f   :  { %v1589_v5 = vpop.f32.mrb[27].mxu1 }
0x1076   :  { %v2453_v11 = vpop.f32.mrb[28].mxu1 }
0x1077   :  { %1632 = vrot.lane.b32.xlu0 %v2453_v11, %s2861_s23  ;;  %v1599_v12 = vpop.f32.mrb[29].mxu1  ;;  %v2066_v11 = vld [vmem:[%s3467_s7 + $0xc8] sm:$0xff] }
0x1078   :  { %1630 = vrot.lane.b32.xlu1 %v1599_v12, %s2861_s23  ;;  %v2683_v12 = vpack.c.bf16 %v2066_v11, %v2065_v9  ;;  %v1980_v9 = vrot.slane %v3345_v42, %v1058_v15 }
0x107a   :  { %v2456_v14 = vpop.f32.mrb[30].mxu1 }
0x107b   :  { %v1609_v27 = vpop.f32.mrb[31].mxu1 }
0x107c   :  { %1640 = vrot.lane.b32.xlu1 %v2456_v14, %s2862_s24  ;;  %v2067_v14 = vld [vmem:[%s3467_s7 + $0xd0] sm:$0xff] }
0x107e   :  { %v2459_v28 = vpop.f32.mrb[32].mxu1 }
0x107f   :  { %v1619_v29 = vpop.f32.mrb[33].mxu1 }
0x1080   :  { %1638 = vrot.lane.b32.xlu1 %v1609_v27, %s2862_s24  ;;  %1646 = vrot.lane.b32.xlu0 %v1619_v29, %s2863_s25  ;;  %v2068_v27 = vld [vmem:[%s3467_s7 + $0xd8] sm:$0xff]  ;;  %v2069_v29 = vld [vmem:[%s3467_s7 + $0xe0] sm:$0xff] }
0x1084   :  { %1648 = vrot.lane.b32.xlu1 %v2459_v28, %s2863_s25  ;;  %v2687_v28 = vpack.c.bf16 %v2068_v27, %v2067_v14  ;;  %v1986_v27 = vrot.slane %v3345_v42, %v1064_v19 }
0x10e9   :  { %v1633_v6 = vpop.permute.xlu0 %1632 }
0x10ea   :  { %v1631_v31 = vpop.permute.xlu1 %1630  ;;  %v1653_v40 = vsel %vm186_vm6, %v2450_v4, %v1633_v6  ;;  %v2675_v4 = vpack.c.bf16 %v2062_v1, %v2061_v0 }
0x10eb   :  { %v1652_v33 = vsel %vm186_vm6, %v1589_v5, %v1631_v31  ;;  %v2063_v5 = vld [vmem:[%s3467_s7 + $0xb0] sm:$0xff]  ;;  %v2070_v31 = vld [vmem:[%s3467_s7 + $0xe8] sm:$0xff] }
0x10ec   :  { %2676 = vmatprep.subr.bf16.mxu0 %v2675_v4  ;;  %v2679_v8 = vpack.c.bf16 %v2064_v7, %v2063_v5  ;;  %v2691_v6 = vpack.c.bf16 %v2070_v31, %v2069_v29 }
0x10ed   :  { %2678 = vmatpush3.bf16.msra.mxu0 %v2675_v4 }
0x10ee   :  { %v1641_v32 = vpop.permute.xlu1 %1640  ;;  %2680 = vmatprep.subr.bf16.mxu0 %v2679_v8 }
0x10ef   :  { %v1655_v41 = vsel %vm729_vm10, %v1653_v40, %v1641_v32  ;;  %v1774_v40 = vrot.slane %v3345_v42, %v852_v24  ;;  %v2071_v24 = vld [vmem:[%s3467_s7 + $0xf0] sm:$0xff] }
0x10f1   :  { %2682 = vmatpush3.bf16.msra.mxu0 %v2679_v8 }
0x10f2   :  { %v1639_v34 = vpop.permute.xlu1 %1638  ;;  %v1647_v23 = vpop.permute.xlu0 %1646  ;;  %2684 = vmatprep.subr.bf16.mxu0 %v2683_v12 }
0x10f3   :  { %v1654_v36 = vsel %vm729_vm10, %v1652_v33, %v1639_v34 }
0x10f4   :  { %v1656_v38 = vsel %vm732_vm9, %v1654_v36, %v1647_v23 }
0x10f5   :  { %2468 = vmatprep.mubr.msk.f32.mxu1 %vm739_vm11, %v1656_v38  ;;  %2686 = vmatpush3.bf16.msra.mxu0 %v2683_v12 }
0x10f6   :  { %v1649_v18 = vpop.permute.xlu1 %1648  ;;  %2688 = vmatprep.subr.bf16.mxu0 %v2687_v28 }
0x10f7   :  { %v1657_v17 = vsel %vm732_vm9, %v1655_v41, %v1649_v18 }
0x10f8   :  { %2469 = vmatmul.mubr.msk.f32.vlgmr.msra.gmra.mrb[34].mxu1 %vm739_vm11, %v1657_v17  ;;  %v1780_v17 = vrot.slane %v3345_v42, %v858_v26 }
0x10f9   :  { %2662 = vmatpush3.bf16.msra.mxu1 %v2659_v56  ;;  %2690 = vmatpush3.bf16.msra.mxu0 %v2687_v28 }
0x10fa   :  { %2664 = vmatprep.subr.bf16.mxu1 %v2663_v59  ;;  %2692 = vmatprep.subr.bf16.mxu0 %v2691_v6 }
0x10fd   :  { %2666 = vmatpush3.bf16.msra.mxu1 %v2663_v59  ;;  %2694 = vmatpush3.bf16.msra.mxu0 %v2691_v6 }
0x11cb   :  { %v2470_v44 = vpop.f32.mrb[34].mxu1 }
0x11cc   :  { %v1740_v45 = vadd.f32 %v2470_v44, %v1661_v43  ;;  %v1734_v46 = vpop.f32.mrb[35].mxu1 }
0x11cd   :  { %v1735_v48 = vadd.f32 %v1734_v46, %v1661_v43 }
0x11ce   :  { %v1744_v49 = vadd.f32 %v1740_v45, %v3222_v35 }
0x11cf   :  { %v1743_v2 = vadd.f32 %v1735_v48, %v3224_v37 }
0x11d0   :  { %v1748_v3 = vsel %vm739_vm11, %v1744_v49, 0.0 }
0x11d1   :  { %1749 = vadd.xlane.f32.xlu1 %v1748_v3  ;;  %v1745_v50 = vsel %vm739_vm11, %v1743_v2, 0.0  ;;  %v1786_v3 = vrot.slane %v3345_v42, %v864_v39 }
0x11d2   :  { %1746 = vadd.xlane.f32.xlu0 %v1745_v50 }
0x125e   :  { %v1750_v51 = vpop.xlane.xlu1 %1749 }
0x125f   :  { %v1752_v52 = vmul.f32 0.03125, %v1750_v51  ;;  %v1747_v53 = vpop.xlane.xlu0 %1746 }
0x1260   :  { %v1751_v10 = vmul.f32 0.03125, %v1747_v53 }
0x1261   :  { %v3354_v13 = vsub.f32 %v1744_v49, %v1752_v52 }
0x1262   :  { %v1753_v21 = vsub.f32 %v1743_v2, %v1751_v10  ;;  %v2072_v2 = vld [vmem:[%s3467_s7 + $0xf8] sm:$0xff]  ;;  %s2864_s7 = smov [#allocation2]  }
0x1263   :  { %v1756_v35 = vmul.f32 %v3354_v13, %v3354_v13  ;;  %v2695_v26 = vpack.c.bf16 %v2072_v2, %v2071_v24  ;;  %s1996_s27 = sshll.u32 %s2864_s7, 4  ;;  %s1997_s27 = int_to_ptr.vmem [resolvable:$true] %s1996_s27 }
0x1264   :  { %v1755_v54 = vmul.f32 %v1753_v21, %v1753_v21  ;;  %s2831_s28 = scalar_lea.vmem %s1997_s27, 256  ;;  %p2836_p1 = scmp.lt.s32.totalorder %s1997_s27, %s1997_s27 }
0x1265   :  { %v1760_v37 = vsel %vm739_vm11, %v1756_v35, 0.0  ;;  %2696 = vmatprep.subr.bf16.mxu0 %v2695_v26  ;;  %p2832_p0 = scmp.ne.s32.totalorder %s1997_s27, %s2831_s28  ;;  %p2837_p2 = scmp.lt.s32.totalorder %s2831_s28, %s2831_s28 }
0x1266   :  { %v1757_v55 = vsel %vm739_vm11, %v1755_v54, 0.0  ;;  %2698 = vmatpush3.bf16.msra.mxu0 %v2695_v26 }
0x1267   :  { %1758 = vadd.xlane.f32.xlu0 %v1757_v55  ;;  %p2838_p3 = por %p2837_p2, %p2836_p1 }
0x1269   :  { %p2839_p4 = pnand %p2838_p3, %p2832_p0 }
0x126b   :  { %1761 = vadd.xlane.f32.xlu0 %v1760_v37 }
0x12f4   :  { %v1759_v32 = vpop.xlane.xlu0 %1758 }
0x12f5   :  { %v1763_v33 = vmul.f32 0.03125, %v1759_v32 }
0x12f7   :  { %v1765_v34 = vadd.f32 1e-05, %v1763_v33 }
0x12f8   :  { %v1762_v23 = vpop.xlane.xlu0 %1761 }
0x12f9   :  { %2823 = vrsqrt.f32 %v1765_v34  ;;  %v1764_v36 = vmul.f32 0.03125, %v1762_v23 }
0x12fb   :  { %v1766_v38 = vadd.f32 1e-05, %v1764_v36 }
0x12fd   :  { %2825 = vrsqrt.f32 %v1766_v38 }
0x1303   :  { %v2824_v41 = vpop.eup %2823 }
0x1304   :  { %v1769_v18 = vmul.f32 %v2824_v41, %v1753_v21  ;;  %v1873_v21 = vrot.slane %v3345_v42, %v951_v47 }
0x1306   :  { %v1775_v43 = vmul.f32 %v1774_v40, %v1769_v18 }
0x1307   :  { %v2826_v44 = vpop.eup %2825 }
0x1308   :  { %v1770_v45 = vmul.f32 %v2826_v44, %v3354_v13  ;;  %v1781_v46 = vadd.f32 %v1780_v17, %v1775_v43 }
0x130a   :  { %v1776_v48 = vmul.f32 %v1774_v40, %v1770_v45  ;;  %2479 = vmatprep.mubr.msk.f32.mxu1 %vm739_vm11, %v1781_v46 }
0x130c   :  { %v1782_v49 = vadd.f32 %v1780_v17, %v1776_v48 }
0x130e   :  { %2480 = vmatmul.mubr.msk.f32.vlgmr.msra.gmra.mrb[36].mxu1 %vm739_vm11, %v1782_v49 }
0x13e1   :  { %v2481_v50 = vpop.f32.mrb[36].mxu1 }
0x13e2   :  { %v1865_v51 = vadd.f32 %v2481_v50, %v1786_v3  ;;  %v1859_v52 = vpop.f32.mrb[37].mxu1 }
0x13e3   :  { %v1860_v53 = vadd.f32 %v1859_v52, %v1786_v3 }
0x13e4   :  { %v1869_v13 = vmax.f32 %v1865_v51, 0.0 }
0x13e5   :  { %v1868_v10 = vmax.f32 %v1860_v53, 0.0 }
0x13e7   :  { %2514 = vmatprep.mubr.f32.mxu0 %v1868_v10 }
0x13e8   :  { %2515 = vmatmul.mubr.f32.vlgmr.msra.gmra.mrb[22].mxu0 %v1869_v13 }
0x14bb   :  { %v2516_v54 = vpop.f32.mrb[22].mxu0 }
0x14bc   :  { %v1946_v55 = vadd.f32 %v2516_v54, %v1873_v21  ;;  %v1940_v35 = vpop.f32.mrb[23].mxu0 }
0x14bd   :  { %v1941_v37 = vadd.f32 %v1940_v35, %v1873_v21 }
0x14be   :  { %v1950_v16 = vadd.f32 %v1946_v55, %v1782_v49 }
0x14bf   :  { %v1949_v22 = vadd.f32 %v1941_v37, %v1781_v46 }
0x14c0   :  { %v1954_v39 = vsel %vm739_vm11, %v1950_v16, 0.0 }
0x14c1   :  { %1955 = vadd.xlane.f32.xlu0 %v1954_v39  ;;  %v1951_v56 = vsel %vm739_vm11, %v1949_v22, 0.0 }
0x14c2   :  { %1952 = vadd.xlane.f32.xlu1 %v1951_v56 }
0x154e   :  { %v1956_v57 = vpop.xlane.xlu0 %1955 }
0x154f   :  { %v1958_v58 = vmul.f32 0.03125, %v1956_v57  ;;  %v1953_v59 = vpop.xlane.xlu1 %1952 }
0x1550   :  { %v1957_v60 = vmul.f32 0.03125, %v1953_v59 }
0x1551   :  { %v1960_v61 = vsub.f32 %v1950_v16, %v1958_v58 }
0x1552   :  { %v1959_v25 = vsub.f32 %v1949_v22, %v1957_v60 }
0x1553   :  { %v1962_v30 = vmul.f32 %v1960_v61, %v1960_v61 }
0x1554   :  { %v1961_v47 = vmul.f32 %v1959_v25, %v1959_v25 }
0x1555   :  { %v1966_v62 = vsel %vm739_vm11, %v1962_v30, 0.0 }
0x1556   :  { %1967 = vadd.xlane.f32.xlu0 %v1966_v62  ;;  %v1963_v63 = vsel %vm739_vm11, %v1961_v47, 0.0 }
0x1557   :  { %1964 = vadd.xlane.f32.xlu1 %v1963_v63 }
0x15e3   :  { %v1968_v0 = vpop.xlane.xlu0 %1967 }
0x15e4   :  { %v1970_v1 = vmul.f32 0.03125, %v1968_v0  ;;  %v1965_v4 = vpop.xlane.xlu1 %1964 }
0x15e5   :  { %v1969_v5 = vmul.f32 0.03125, %v1965_v4 }
0x15e6   :  { %v1972_v7 = vadd.f32 1e-05, %v1970_v1 }
0x15e7   :  { %v1971_v8 = vadd.f32 1e-05, %v1969_v5 }
0x15e8   :  { %2827 = vrsqrt.f32 %v1972_v7 }
0x15e9   :  { %2829 = vrsqrt.f32 %v1971_v8 }
0x15f2   :  { %v2828_v11 = vpop.eup %2827 }
0x15f3   :  { %v2830_v12 = vpop.eup %2829  ;;  %v1976_v14 = vmul.f32 %v2828_v11, %v1960_v61 }
0x15f4   :  { %v1975_v28 = vmul.f32 %v2830_v12, %v1959_v25 }
0x15f5   :  { %v1982_v29 = vmul.f32 %v1980_v9, %v1976_v14 }
0x15f6   :  { %v1981_v31 = vmul.f32 %v1980_v9, %v1975_v28 }
0x15f7   :  { %v1988_v6 = vadd.f32 %v1986_v27, %v1982_v29 }
0x15f8   :  { %v1987_v32 = vadd.f32 %v1986_v27, %v1981_v31 }
0x15f9   :  { %1990 = vst.msk [vmem:[#allocation2 + $0x8] sm:$0xff] %vm739_vm11, %v1988_v6 }
0x15fa   :  { %1989 = vst.msk [vmem:[#allocation2] sm:$0xff] %vm739_vm11, %v1987_v32 }
0x15fb   :  { %2842 = shalt.err (!%p2839_p4)
}
0x15fc   :  { %s2843_s6 = scalar_lea.hbm %s3469_s9, 256 }
0x15fd   :  { %p2844_p5 = scmp.ne.s32.totalorder %s3469_s9, %s2843_s6  ;;  %p2847_p6 = scmp.lt.u32.totalorder %s2843_s6, %s3469_s9 }
0x15ff   :  { %p2849_p7 = pnand %p2847_p6, %p2844_p5 }
0x1601   :  { %2852 = shalt.err (!%p2849_p7)
}
0x1602   :  { %s2865_s2 = smov 128  }
0x1603   :  { %2002 = dma.vmem_to_hbm [thread:$0]  %s1997_s27, 256, %s3469_s9, [#allocation3], %s2865_s2, %s2865_s2, %s2861_s23  }
0x1604   :  { %2853 = dma.done.wait [#allocation3], 256  }
0x1605   :  { %2854 = vsyncadd [#allocation3], 4294967040 }
0x1606   :  { %2006 = vsyncpa [#allocation3], 1 }

</bundles_post_ra>
